<compile_context>
chip_gen: v5e
topology: v5e:2x2
jax: 0.10.0
libtpu: 0.0.40
codegen_flags: <defaults>
</compile_context>

<pallas_src>
import functools

import numpy as np
import jax
import jax.numpy as jnp
from jax.experimental import pallas as pl
from jax.experimental.pallas import tpu as pltpu


# (stride, padding, instance_norm+leaky_relu, tanh) for the 4 ConvTranspose1d layers.
LAYER_SPECS = (
    (1, 0, True, False),   # block1: ConvT(k=12, s=1, p=0) + IN + LeakyReLU
    (2, 1, True, False),   # block3: ConvT(k=4,  s=2, p=1) + IN + LeakyReLU
    (2, 1, True, False),   # block4: ConvT(k=4,  s=2, p=1) + IN + LeakyReLU
    (2, 1, False, True),   # block5: ConvT(k=4,  s=2, p=1) + tanh
)


# ---------------------------------------------------------------------------
# Fused Pallas kernel: whole generator forward for ONE batch element.
# ---------------------------------------------------------------------------
def _generator_kernel(x_ref, w1_ref, b1_ref, w2_ref, b2_ref, w3_ref, b3_ref,
                      w4_ref, b4_ref, o_ref, *, cfgs, L0):
    # x_ref : (1, L0, C0)        latent, channels-last (channels on lanes)
    # wX_ref: (K, Cin, Cout)     flipped ConvTranspose1d taps
    # bX_ref: (1, Cout)
    # o_ref : (1, L_out, C_out)
    wb = ((w1_ref, b1_ref), (w2_ref, b2_ref), (w3_ref, b3_ref), (w4_ref, b4_ref))

    x = x_ref[0]                                       # (L_in, C_in)
    L_in = L0
    for (K, stride, padding, do_norm, do_tanh), (w_ref, b_ref) in zip(cfgs, wb):
        C_in = x.shape[1]
        L_out = (L_in - 1) * stride - 2 * padding + K
        pad = K - 1 - padding
        L_pad = (L_in - 1) * stride + 1 + 2 * pad

        # Zero-upsample + pad, entirely inside VMEM (no XLA scatter/pad ops).
        if L_in == 1:
            # Place the single input row at sublane `pad`; pure VPU.
            rr = jax.lax.broadcasted_iota(jnp.int32, (L_pad, C_in), 0)
            x_pad = jnp.where(rr == pad, jnp.broadcast_to(x, (L_pad, C_in)), 0.0)
        else:
            # 0/1 placement matrix: U[pad + stride*i, i] = 1  ->  one MXU matmul.
            row = jax.lax.broadcasted_iota(jnp.int32, (L_pad, L_in), 0)
            col = jax.lax.broadcasted_iota(jnp.int32, (L_pad, L_in), 1)
            U = (row == pad + stride * col).astype(jnp.float32)
            x_pad = jnp.dot(U, x, preferred_element_type=jnp.float32)   # (L_pad, C_in)

        # Stride-1 VALID conv with the flipped kernel = ConvTranspose1d.
        acc = jnp.dot(x_pad[0:L_out, :], w_ref[0],
                      preferred_element_type=jnp.float32)               # (L_out, C_out)
        for k in range(1, K):
            acc = acc + jnp.dot(x_pad[k:k + L_out, :], w_ref[k],
                                preferred_element_type=jnp.float32)
        acc = acc + b_ref[...]                                          # (1, C_out) bcast

        if do_norm:
            # InstanceNorm1d (no affine, biased variance, eps=1e-5) + LeakyReLU(0.2)
            mean = jnp.mean(acc, axis=0, keepdims=True)
            cen = acc - mean
            var = jnp.mean(cen * cen, axis=0, keepdims=True)
            acc = cen * jax.lax.rsqrt(var + 1e-5)
            acc = jnp.where(acc >= 0.0, acc, 0.2 * acc)
        if do_tanh:
            acc = jnp.tanh(acc)

        x = acc
        L_in = L_out

    o_ref[0] = x


# ---------------------------------------------------------------------------
# Wrapper: single fused pallas_call, gridded over the batch only.
# ---------------------------------------------------------------------------
def generator_forward(params, inp, code):
    """inp: (N, in_channels, L), code: (N, 1, L)  -- PyTorch NCL convention."""
    N, _, L0 = inp.shape
    # Tiny boundary glue: concat channels, NCL -> NLC (channels on lanes).
    x0 = jnp.concatenate([inp, code], axis=1).astype(jnp.float32)    # (N, C0, L0)
    x0 = jnp.transpose(x0, (0, 2, 1))                                # (N, L0, C0)
    C0 = x0.shape[2]

    cfgs = []
    flat_args = [x0]
    in_specs = [pl.BlockSpec((1, L0, C0), lambda n: (n, 0, 0))]
    L_cur = L0
    for (W, b), (stride, padding, do_norm, do_tanh) in zip(params, LAYER_SPECS):
        C_in, C_out, K = W.shape
        assert padding <= K - 1
        # Flipped taps, (K, Cin, Cout); bias as (1, Cout).  (Tiny host-side prep.)
        w_flip = jnp.transpose(W, (2, 0, 1))[::-1].astype(jnp.float32)
        b_row = b.reshape(1, C_out).astype(jnp.float32)
        flat_args += [w_flip, b_row]
        in_specs += [pl.BlockSpec((K, C_in, C_out), lambda n: (0, 0, 0)),
                     pl.BlockSpec((1, C_out), lambda n: (0, 0))]
        cfgs.append((K, stride, padding, do_norm, do_tanh))
        L_cur = (L_cur - 1) * stride - 2 * padding + K
    C_final = params[-1][0].shape[1]

    kernel = functools.partial(_generator_kernel, cfgs=tuple(cfgs), L0=L0)
    out_nlc = pl.pallas_call(
        kernel,
        out_shape=jax.ShapeDtypeStruct((N, L_cur, C_final), jnp.float32),
        grid=(N,),
        in_specs=in_specs,
        out_specs=pl.BlockSpec((1, L_cur, C_final), lambda n: (n, 0, 0)),
        compiler_params=pltpu.CompilerParams(
            dimension_semantics=("parallel",)),
    )(*flat_args)
    return jnp.transpose(out_nlc, (0, 2, 1))                         # (N, C_out, L_out)


# ---------------------------------------------------------------------------
# Parameters (matching the PyTorch module's layer shapes)
# ---------------------------------------------------------------------------
def init_generator_params(key, in_channels, out_channels):
    # (C_in, C_out, K) per ConvTranspose1d layer, matching the PyTorch module.
    specs = [
        (in_channels + 1, 256, 12),   # block1
        (256, 128, 4),                # block3
        (128, 64, 4),                 # block4
        (64, out_channels, 4),        # block5
    ]
    params = []
    for (cin, cout, k) in specs:
        key, kw, kb = jax.random.split(key, 3)
        bound = 1.0 / np.sqrt(cin * k)
        W = jax.random.uniform(kw, (cin, cout, k), jnp.float32, -bound, bound)
        bb = jax.random.uniform(kb, (cout,), jnp.float32, -bound, bound)
        params.append((W, bb))
    return params


# ---------------------------------------------------------------------------
# Independent numpy reference (direct ConvTranspose1d definition)
# ---------------------------------------------------------------------------
def _np_convT1d(x, W, b, stride, padding):
    N, Cin, Lin = x.shape
    _, Cout, K = W.shape
    Lout = (Lin - 1) * stride - 2 * padding + K
    y = np.zeros((N, Cout, Lout), np.float64)
    for n in range(N):
        for i in range(Lin):
            for k in range(K):
                t = i * stride - padding + k
                if 0 <= t < Lout:
                    y[n, :, t] += x[n, :, i] @ W[:, :, k]
    return y + b[None, :, None]


def _np_in_lrelu(y, eps=1e-5, slope=0.2):
    mean = y.mean(axis=2, keepdims=True)
    var = y.var(axis=2, keepdims=True)          # biased, like InstanceNorm1d
    y = (y - mean) / np.sqrt(var + eps)
    return np.where(y >= 0, y, slope * y)


def _reference_forward(params, inp, code):
    x = np.concatenate([np.asarray(inp, np.float64),
                        np.asarray(code, np.float64)], axis=1)
    p = [(np.asarray(W, np.float64), np.asarray(b, np.float64)) for W, b in params]
    (W1, b1), (W2, b2), (W3, b3), (W4, b4) = p
    x = _np_in_lrelu(_np_convT1d(x, W1, b1, 1, 0))
    x = _np_in_lrelu(_np_convT1d(x, W2, b2, 2, 1))
    x = _np_in_lrelu(_np_convT1d(x, W3, b3, 2, 1))
    return np.tanh(_np_convT1d(x, W4, b4, 2, 1))


# ---------------------------------------------------------------------------
if __name__ == "__main__":
    key = jax.random.PRNGKey(0)
    in_channels, out_channels = 4, 2
    N, L = 2, 1                      # latent "image" of length 1, as in CDCGAN

    kp, ki, kc = jax.random.split(key, 3)
    params = init_generator_params(kp, in_channels, out_channels)
    inp = jax.random.normal(ki, (N, in_channels, L), jnp.float32)
    code = jax.random.normal(kc, (N, 1, L), jnp.float32)

    fwd = jax.jit(generator_forward)
    out = fwd(params, inp, code)
    out = jax.block_until_ready(out)

    assert out.shape == (N, out_channels, 96), out.shape

    ref = _reference_forward(params, inp, code)
    np.testing.assert_allclose(np.asarray(out, np.float64), ref,
                               rtol=5e-2, atol=5e-2)
    print("KERNEL_OK")
</pallas_src>

<mosaic_0001>
module attributes {stable_mosaic.version = 11 : i64} {
  func.func @_generator_kernel(%arg0: i32, %arg1: memref<1x1x5xf32, #tpu.memory_space<vmem>>, %arg2: memref<12x5x256xf32, #tpu.memory_space<vmem>>, %arg3: memref<1x256xf32, #tpu.memory_space<vmem>>, %arg4: memref<4x256x128xf32, #tpu.memory_space<vmem>>, %arg5: memref<1x128xf32, #tpu.memory_space<vmem>>, %arg6: memref<4x128x64xf32, #tpu.memory_space<vmem>>, %arg7: memref<1x64xf32, #tpu.memory_space<vmem>>, %arg8: memref<4x64x2xf32, #tpu.memory_space<vmem>>, %arg9: memref<1x2xf32, #tpu.memory_space<vmem>>, %arg10: memref<1x96x2xf32, #tpu.memory_space<vmem>>) attributes {dimension_semantics = [#tpu.dimension_semantics<parallel>], iteration_bounds = array<i64: 2>, scalar_prefetch = 0 : i64, scratch_operands = 0 : i64, tpu.core_type = #tpu.core_type<tc>, window_params = [{transform_indices = @transform_0, window_bounds = array<i64: 1, 1, 5>}, {pipeline_mode = #tpu.pipeline_mode<synchronous>, transform_indices = @transform_1, window_bounds = array<i64: 12, 5, 256>}, {pipeline_mode = #tpu.pipeline_mode<synchronous>, transform_indices = @transform_2, window_bounds = array<i64: 1, 256>}, {pipeline_mode = #tpu.pipeline_mode<synchronous>, transform_indices = @transform_3, window_bounds = array<i64: 4, 256, 128>}, {pipeline_mode = #tpu.pipeline_mode<synchronous>, transform_indices = @transform_4, window_bounds = array<i64: 1, 128>}, {pipeline_mode = #tpu.pipeline_mode<synchronous>, transform_indices = @transform_5, window_bounds = array<i64: 4, 128, 64>}, {pipeline_mode = #tpu.pipeline_mode<synchronous>, transform_indices = @transform_6, window_bounds = array<i64: 1, 64>}, {pipeline_mode = #tpu.pipeline_mode<synchronous>, transform_indices = @transform_7, window_bounds = array<i64: 4, 64, 2>}, {pipeline_mode = #tpu.pipeline_mode<synchronous>, transform_indices = @transform_8, window_bounds = array<i64: 1, 2>}, {transform_indices = @transform_9, window_bounds = array<i64: 1, 96, 2>}]} {
    %c0 = arith.constant 0 : index
    %c0_0 = arith.constant 0 : index
    %c0_1 = arith.constant 0 : index
    %0 = vector.load %arg1[%c0, %c0_0, %c0_1] : memref<1x1x5xf32, #tpu.memory_space<vmem>>, vector<1x1x5xf32>
    %1 = vector.shape_cast %0 : vector<1x1x5xf32> to vector<1x5xf32>
    %2 = tpu.iota {dimensions = array<i32: 0>} : vector<23x5xi32>
    %c11_i32 = arith.constant 11 : i32
    %3 = vector.broadcast %c11_i32 : i32 to vector<23x5xi32>
    %4 = arith.cmpi eq, %2, %3 : vector<23x5xi32>
    %5 = vector.shape_cast %1 : vector<1x5xf32> to vector<1x5xf32>
    %6 = vector.broadcast %5 : vector<1x5xf32> to vector<23x5xf32>
    %cst = arith.constant 0.000000e+00 : f32
    %7 = vector.broadcast %cst : f32 to vector<23x5xf32>
    %8 = arith.select %4, %6, %7 : vector<23x5xi1>, vector<23x5xf32>
    %9 = vector.extract_strided_slice %8 {offsets = [0, 0], sizes = [12, 5], strides = [1, 1]} : vector<23x5xf32> to vector<12x5xf32>
    %c0_2 = arith.constant 0 : index
    %c0_3 = arith.constant 0 : index
    %c0_4 = arith.constant 0 : index
    %10 = vector.load %arg2[%c0_2, %c0_3, %c0_4] : memref<12x5x256xf32, #tpu.memory_space<vmem>>, vector<1x5x256xf32>
    %11 = vector.shape_cast %10 : vector<1x5x256xf32> to vector<5x256xf32>
    %cst_5 = arith.constant dense<0.000000e+00> : vector<12x256xf32>
    %12 = tpu.matmul %9, %11, %cst_5 {dimension_numbers = #tpu.dot_dimension_numbers<[1], [0], [0], [1], [0, 0, 1, 1], [], []>} : vector<12x5xf32>, vector<5x256xf32>, vector<12x256xf32> -> vector<12x256xf32>
    %13 = vector.extract_strided_slice %8 {offsets = [1, 0], sizes = [12, 5], strides = [1, 1]} : vector<23x5xf32> to vector<12x5xf32>
    %c1 = arith.constant 1 : index
    %c0_6 = arith.constant 0 : index
    %c0_7 = arith.constant 0 : index
    %14 = vector.load %arg2[%c1, %c0_6, %c0_7] : memref<12x5x256xf32, #tpu.memory_space<vmem>>, vector<1x5x256xf32>
    %15 = vector.shape_cast %14 : vector<1x5x256xf32> to vector<5x256xf32>
    %cst_8 = arith.constant dense<0.000000e+00> : vector<12x256xf32>
    %16 = tpu.matmul %13, %15, %cst_8 {dimension_numbers = #tpu.dot_dimension_numbers<[1], [0], [0], [1], [0, 0, 1, 1], [], []>} : vector<12x5xf32>, vector<5x256xf32>, vector<12x256xf32> -> vector<12x256xf32>
    %17 = arith.addf %12, %16 : vector<12x256xf32>
    %18 = vector.extract_strided_slice %8 {offsets = [2, 0], sizes = [12, 5], strides = [1, 1]} : vector<23x5xf32> to vector<12x5xf32>
    %c2 = arith.constant 2 : index
    %c0_9 = arith.constant 0 : index
    %c0_10 = arith.constant 0 : index
    %19 = vector.load %arg2[%c2, %c0_9, %c0_10] : memref<12x5x256xf32, #tpu.memory_space<vmem>>, vector<1x5x256xf32>
    %20 = vector.shape_cast %19 : vector<1x5x256xf32> to vector<5x256xf32>
    %cst_11 = arith.constant dense<0.000000e+00> : vector<12x256xf32>
    %21 = tpu.matmul %18, %20, %cst_11 {dimension_numbers = #tpu.dot_dimension_numbers<[1], [0], [0], [1], [0, 0, 1, 1], [], []>} : vector<12x5xf32>, vector<5x256xf32>, vector<12x256xf32> -> vector<12x256xf32>
    %22 = arith.addf %17, %21 : vector<12x256xf32>
    %23 = vector.extract_strided_slice %8 {offsets = [3, 0], sizes = [12, 5], strides = [1, 1]} : vector<23x5xf32> to vector<12x5xf32>
    %c3 = arith.constant 3 : index
    %c0_12 = arith.constant 0 : index
    %c0_13 = arith.constant 0 : index
    %24 = vector.load %arg2[%c3, %c0_12, %c0_13] : memref<12x5x256xf32, #tpu.memory_space<vmem>>, vector<1x5x256xf32>
    %25 = vector.shape_cast %24 : vector<1x5x256xf32> to vector<5x256xf32>
    %cst_14 = arith.constant dense<0.000000e+00> : vector<12x256xf32>
    %26 = tpu.matmul %23, %25, %cst_14 {dimension_numbers = #tpu.dot_dimension_numbers<[1], [0], [0], [1], [0, 0, 1, 1], [], []>} : vector<12x5xf32>, vector<5x256xf32>, vector<12x256xf32> -> vector<12x256xf32>
    %27 = arith.addf %22, %26 : vector<12x256xf32>
    %28 = vector.extract_strided_slice %8 {offsets = [4, 0], sizes = [12, 5], strides = [1, 1]} : vector<23x5xf32> to vector<12x5xf32>
    %c4 = arith.constant 4 : index
    %c0_15 = arith.constant 0 : index
    %c0_16 = arith.constant 0 : index
    %29 = vector.load %arg2[%c4, %c0_15, %c0_16] : memref<12x5x256xf32, #tpu.memory_space<vmem>>, vector<1x5x256xf32>
    %30 = vector.shape_cast %29 : vector<1x5x256xf32> to vector<5x256xf32>
    %cst_17 = arith.constant dense<0.000000e+00> : vector<12x256xf32>
    %31 = tpu.matmul %28, %30, %cst_17 {dimension_numbers = #tpu.dot_dimension_numbers<[1], [0], [0], [1], [0, 0, 1, 1], [], []>} : vector<12x5xf32>, vector<5x256xf32>, vector<12x256xf32> -> vector<12x256xf32>
    %32 = arith.addf %27, %31 : vector<12x256xf32>
    %33 = vector.extract_strided_slice %8 {offsets = [5, 0], sizes = [12, 5], strides = [1, 1]} : vector<23x5xf32> to vector<12x5xf32>
    %c5 = arith.constant 5 : index
    %c0_18 = arith.constant 0 : index
    %c0_19 = arith.constant 0 : index
    %34 = vector.load %arg2[%c5, %c0_18, %c0_19] : memref<12x5x256xf32, #tpu.memory_space<vmem>>, vector<1x5x256xf32>
    %35 = vector.shape_cast %34 : vector<1x5x256xf32> to vector<5x256xf32>
    %cst_20 = arith.constant dense<0.000000e+00> : vector<12x256xf32>
    %36 = tpu.matmul %33, %35, %cst_20 {dimension_numbers = #tpu.dot_dimension_numbers<[1], [0], [0], [1], [0, 0, 1, 1], [], []>} : vector<12x5xf32>, vector<5x256xf32>, vector<12x256xf32> -> vector<12x256xf32>
    %37 = arith.addf %32, %36 : vector<12x256xf32>
    %38 = vector.extract_strided_slice %8 {offsets = [6, 0], sizes = [12, 5], strides = [1, 1]} : vector<23x5xf32> to vector<12x5xf32>
    %c6 = arith.constant 6 : index
    %c0_21 = arith.constant 0 : index
    %c0_22 = arith.constant 0 : index
    %39 = vector.load %arg2[%c6, %c0_21, %c0_22] : memref<12x5x256xf32, #tpu.memory_space<vmem>>, vector<1x5x256xf32>
    %40 = vector.shape_cast %39 : vector<1x5x256xf32> to vector<5x256xf32>
    %cst_23 = arith.constant dense<0.000000e+00> : vector<12x256xf32>
    %41 = tpu.matmul %38, %40, %cst_23 {dimension_numbers = #tpu.dot_dimension_numbers<[1], [0], [0], [1], [0, 0, 1, 1], [], []>} : vector<12x5xf32>, vector<5x256xf32>, vector<12x256xf32> -> vector<12x256xf32>
    %42 = arith.addf %37, %41 : vector<12x256xf32>
    %43 = vector.extract_strided_slice %8 {offsets = [7, 0], sizes = [12, 5], strides = [1, 1]} : vector<23x5xf32> to vector<12x5xf32>
    %c7 = arith.constant 7 : index
    %c0_24 = arith.constant 0 : index
    %c0_25 = arith.constant 0 : index
    %44 = vector.load %arg2[%c7, %c0_24, %c0_25] : memref<12x5x256xf32, #tpu.memory_space<vmem>>, vector<1x5x256xf32>
    %45 = vector.shape_cast %44 : vector<1x5x256xf32> to vector<5x256xf32>
    %cst_26 = arith.constant dense<0.000000e+00> : vector<12x256xf32>
    %46 = tpu.matmul %43, %45, %cst_26 {dimension_numbers = #tpu.dot_dimension_numbers<[1], [0], [0], [1], [0, 0, 1, 1], [], []>} : vector<12x5xf32>, vector<5x256xf32>, vector<12x256xf32> -> vector<12x256xf32>
    %47 = arith.addf %42, %46 : vector<12x256xf32>
    %48 = vector.extract_strided_slice %8 {offsets = [8, 0], sizes = [12, 5], strides = [1, 1]} : vector<23x5xf32> to vector<12x5xf32>
    %c8 = arith.constant 8 : index
    %c0_27 = arith.constant 0 : index
    %c0_28 = arith.constant 0 : index
    %49 = vector.load %arg2[%c8, %c0_27, %c0_28] : memref<12x5x256xf32, #tpu.memory_space<vmem>>, vector<1x5x256xf32>
    %50 = vector.shape_cast %49 : vector<1x5x256xf32> to vector<5x256xf32>
    %cst_29 = arith.constant dense<0.000000e+00> : vector<12x256xf32>
    %51 = tpu.matmul %48, %50, %cst_29 {dimension_numbers = #tpu.dot_dimension_numbers<[1], [0], [0], [1], [0, 0, 1, 1], [], []>} : vector<12x5xf32>, vector<5x256xf32>, vector<12x256xf32> -> vector<12x256xf32>
    %52 = arith.addf %47, %51 : vector<12x256xf32>
    %53 = vector.extract_strided_slice %8 {offsets = [9, 0], sizes = [12, 5], strides = [1, 1]} : vector<23x5xf32> to vector<12x5xf32>
    %c9 = arith.constant 9 : index
    %c0_30 = arith.constant 0 : index
    %c0_31 = arith.constant 0 : index
    %54 = vector.load %arg2[%c9, %c0_30, %c0_31] : memref<12x5x256xf32, #tpu.memory_space<vmem>>, vector<1x5x256xf32>
    %55 = vector.shape_cast %54 : vector<1x5x256xf32> to vector<5x256xf32>
    %cst_32 = arith.constant dense<0.000000e+00> : vector<12x256xf32>
    %56 = tpu.matmul %53, %55, %cst_32 {dimension_numbers = #tpu.dot_dimension_numbers<[1], [0], [0], [1], [0, 0, 1, 1], [], []>} : vector<12x5xf32>, vector<5x256xf32>, vector<12x256xf32> -> vector<12x256xf32>
    %57 = arith.addf %52, %56 : vector<12x256xf32>
    %58 = vector.extract_strided_slice %8 {offsets = [10, 0], sizes = [12, 5], strides = [1, 1]} : vector<23x5xf32> to vector<12x5xf32>
    %c10 = arith.constant 10 : index
    %c0_33 = arith.constant 0 : index
    %c0_34 = arith.constant 0 : index
    %59 = vector.load %arg2[%c10, %c0_33, %c0_34] : memref<12x5x256xf32, #tpu.memory_space<vmem>>, vector<1x5x256xf32>
    %60 = vector.shape_cast %59 : vector<1x5x256xf32> to vector<5x256xf32>
    %cst_35 = arith.constant dense<0.000000e+00> : vector<12x256xf32>
    %61 = tpu.matmul %58, %60, %cst_35 {dimension_numbers = #tpu.dot_dimension_numbers<[1], [0], [0], [1], [0, 0, 1, 1], [], []>} : vector<12x5xf32>, vector<5x256xf32>, vector<12x256xf32> -> vector<12x256xf32>
    %62 = arith.addf %57, %61 : vector<12x256xf32>
    %63 = vector.extract_strided_slice %8 {offsets = [11, 0], sizes = [12, 5], strides = [1, 1]} : vector<23x5xf32> to vector<12x5xf32>
    %c11 = arith.constant 11 : index
    %c0_36 = arith.constant 0 : index
    %c0_37 = arith.constant 0 : index
    %64 = vector.load %arg2[%c11, %c0_36, %c0_37] : memref<12x5x256xf32, #tpu.memory_space<vmem>>, vector<1x5x256xf32>
    %65 = vector.shape_cast %64 : vector<1x5x256xf32> to vector<5x256xf32>
    %cst_38 = arith.constant dense<0.000000e+00> : vector<12x256xf32>
    %66 = tpu.matmul %63, %65, %cst_38 {dimension_numbers = #tpu.dot_dimension_numbers<[1], [0], [0], [1], [0, 0, 1, 1], [], []>} : vector<12x5xf32>, vector<5x256xf32>, vector<12x256xf32> -> vector<12x256xf32>
    %67 = arith.addf %62, %66 : vector<12x256xf32>
    %c0_39 = arith.constant 0 : index
    %c0_40 = arith.constant 0 : index
    %68 = vector.load %arg3[%c0_39, %c0_40] : memref<1x256xf32, #tpu.memory_space<vmem>>, vector<1x256xf32>
    %69 = vector.broadcast %68 : vector<1x256xf32> to vector<12x256xf32>
    %70 = arith.addf %67, %69 : vector<12x256xf32>
    %cst_41 = arith.constant dense<0.000000e+00> : vector<256xf32>
    %71 = vector.multi_reduction <add>, %70, %cst_41 [0] : vector<12x256xf32> to vector<256xf32>
    %72 = vector.shape_cast %71 : vector<256xf32> to vector<1x256xf32>
    %cst_42 = arith.constant 1.200000e+01 : f32
    %73 = vector.broadcast %cst_42 : f32 to vector<1x256xf32>
    %74 = arith.divf %72, %73 : vector<1x256xf32>
    %75 = vector.broadcast %74 : vector<1x256xf32> to vector<12x256xf32>
    %76 = arith.subf %70, %75 : vector<12x256xf32>
    %77 = arith.mulf %76, %76 : vector<12x256xf32>
    %cst_43 = arith.constant dense<0.000000e+00> : vector<256xf32>
    %78 = vector.multi_reduction <add>, %77, %cst_43 [0] : vector<12x256xf32> to vector<256xf32>
    %79 = vector.shape_cast %78 : vector<256xf32> to vector<1x256xf32>
    %cst_44 = arith.constant 1.200000e+01 : f32
    %80 = vector.broadcast %cst_44 : f32 to vector<1x256xf32>
    %81 = arith.divf %79, %80 : vector<1x256xf32>
    %cst_45 = arith.constant 9.99999974E-6 : f32
    %82 = vector.broadcast %cst_45 : f32 to vector<1x256xf32>
    %83 = arith.addf %81, %82 : vector<1x256xf32>
    %84 = math.rsqrt %83 : vector<1x256xf32>
    %85 = vector.broadcast %84 : vector<1x256xf32> to vector<12x256xf32>
    %86 = arith.mulf %76, %85 : vector<12x256xf32>
    %cst_46 = arith.constant 0.000000e+00 : f32
    %87 = vector.broadcast %cst_46 : f32 to vector<12x256xf32>
    %88 = arith.cmpf oge, %86, %87 : vector<12x256xf32>
    %cst_47 = arith.constant 2.000000e-01 : f32
    %89 = vector.broadcast %cst_47 : f32 to vector<12x256xf32>
    %90 = arith.mulf %89, %86 : vector<12x256xf32>
    %91 = arith.select %88, %86, %90 : vector<12x256xi1>, vector<12x256xf32>
    %92 = tpu.iota {dimensions = array<i32: 0>} : vector<27x12xi32>
    %93 = tpu.iota {dimensions = array<i32: 1>} : vector<27x12xi32>
    %c2_i32 = arith.constant 2 : i32
    %94 = vector.broadcast %c2_i32 : i32 to vector<27x12xi32>
    %95 = arith.muli %94, %93 : vector<27x12xi32>
    %c2_i32_48 = arith.constant 2 : i32
    %96 = vector.broadcast %c2_i32_48 : i32 to vector<27x12xi32>
    %97 = arith.addi %96, %95 : vector<27x12xi32>
    %98 = arith.cmpi eq, %92, %97 : vector<27x12xi32>
    %99 = arith.extui %98 : vector<27x12xi1> to vector<27x12xi32>
    %100 = arith.sitofp %99 : vector<27x12xi32> to vector<27x12xf32>
    %cst_49 = arith.constant dense<0.000000e+00> : vector<27x256xf32>
    %101 = tpu.matmul %100, %91, %cst_49 {dimension_numbers = #tpu.dot_dimension_numbers<[1], [0], [0], [1], [0, 0, 1, 1], [], []>} : vector<27x12xf32>, vector<12x256xf32>, vector<27x256xf32> -> vector<27x256xf32>
    %102 = vector.extract_strided_slice %101 {offsets = [0, 0], sizes = [24, 256], strides = [1, 1]} : vector<27x256xf32> to vector<24x256xf32>
    %c0_50 = arith.constant 0 : index
    %c0_51 = arith.constant 0 : index
    %c0_52 = arith.constant 0 : index
    %103 = vector.load %arg4[%c0_50, %c0_51, %c0_52] : memref<4x256x128xf32, #tpu.memory_space<vmem>>, vector<1x256x128xf32>
    %104 = vector.shape_cast %103 : vector<1x256x128xf32> to vector<256x128xf32>
    %cst_53 = arith.constant dense<0.000000e+00> : vector<24x128xf32>
    %105 = tpu.matmul %102, %104, %cst_53 {dimension_numbers = #tpu.dot_dimension_numbers<[1], [0], [0], [1], [0, 0, 1, 1], [], []>} : vector<24x256xf32>, vector<256x128xf32>, vector<24x128xf32> -> vector<24x128xf32>
    %106 = vector.extract_strided_slice %101 {offsets = [1, 0], sizes = [24, 256], strides = [1, 1]} : vector<27x256xf32> to vector<24x256xf32>
    %c1_54 = arith.constant 1 : index
    %c0_55 = arith.constant 0 : index
    %c0_56 = arith.constant 0 : index
    %107 = vector.load %arg4[%c1_54, %c0_55, %c0_56] : memref<4x256x128xf32, #tpu.memory_space<vmem>>, vector<1x256x128xf32>
    %108 = vector.shape_cast %107 : vector<1x256x128xf32> to vector<256x128xf32>
    %cst_57 = arith.constant dense<0.000000e+00> : vector<24x128xf32>
    %109 = tpu.matmul %106, %108, %cst_57 {dimension_numbers = #tpu.dot_dimension_numbers<[1], [0], [0], [1], [0, 0, 1, 1], [], []>} : vector<24x256xf32>, vector<256x128xf32>, vector<24x128xf32> -> vector<24x128xf32>
    %110 = arith.addf %105, %109 : vector<24x128xf32>
    %111 = vector.extract_strided_slice %101 {offsets = [2, 0], sizes = [24, 256], strides = [1, 1]} : vector<27x256xf32> to vector<24x256xf32>
    %c2_58 = arith.constant 2 : index
    %c0_59 = arith.constant 0 : index
    %c0_60 = arith.constant 0 : index
    %112 = vector.load %arg4[%c2_58, %c0_59, %c0_60] : memref<4x256x128xf32, #tpu.memory_space<vmem>>, vector<1x256x128xf32>
    %113 = vector.shape_cast %112 : vector<1x256x128xf32> to vector<256x128xf32>
    %cst_61 = arith.constant dense<0.000000e+00> : vector<24x128xf32>
    %114 = tpu.matmul %111, %113, %cst_61 {dimension_numbers = #tpu.dot_dimension_numbers<[1], [0], [0], [1], [0, 0, 1, 1], [], []>} : vector<24x256xf32>, vector<256x128xf32>, vector<24x128xf32> -> vector<24x128xf32>
    %115 = arith.addf %110, %114 : vector<24x128xf32>
    %116 = vector.extract_strided_slice %101 {offsets = [3, 0], sizes = [24, 256], strides = [1, 1]} : vector<27x256xf32> to vector<24x256xf32>
    %c3_62 = arith.constant 3 : index
    %c0_63 = arith.constant 0 : index
    %c0_64 = arith.constant 0 : index
    %117 = vector.load %arg4[%c3_62, %c0_63, %c0_64] : memref<4x256x128xf32, #tpu.memory_space<vmem>>, vector<1x256x128xf32>
    %118 = vector.shape_cast %117 : vector<1x256x128xf32> to vector<256x128xf32>
    %cst_65 = arith.constant dense<0.000000e+00> : vector<24x128xf32>
    %119 = tpu.matmul %116, %118, %cst_65 {dimension_numbers = #tpu.dot_dimension_numbers<[1], [0], [0], [1], [0, 0, 1, 1], [], []>} : vector<24x256xf32>, vector<256x128xf32>, vector<24x128xf32> -> vector<24x128xf32>
    %120 = arith.addf %115, %119 : vector<24x128xf32>
    %c0_66 = arith.constant 0 : index
    %c0_67 = arith.constant 0 : index
    %121 = vector.load %arg5[%c0_66, %c0_67] : memref<1x128xf32, #tpu.memory_space<vmem>>, vector<1x128xf32>
    %122 = vector.broadcast %121 : vector<1x128xf32> to vector<24x128xf32>
    %123 = arith.addf %120, %122 : vector<24x128xf32>
    %cst_68 = arith.constant dense<0.000000e+00> : vector<128xf32>
    %124 = vector.multi_reduction <add>, %123, %cst_68 [0] : vector<24x128xf32> to vector<128xf32>
    %125 = vector.shape_cast %124 : vector<128xf32> to vector<1x128xf32>
    %cst_69 = arith.constant 2.400000e+01 : f32
    %126 = vector.broadcast %cst_69 : f32 to vector<1x128xf32>
    %127 = arith.divf %125, %126 : vector<1x128xf32>
    %128 = vector.broadcast %127 : vector<1x128xf32> to vector<24x128xf32>
    %129 = arith.subf %123, %128 : vector<24x128xf32>
    %130 = arith.mulf %129, %129 : vector<24x128xf32>
    %cst_70 = arith.constant dense<0.000000e+00> : vector<128xf32>
    %131 = vector.multi_reduction <add>, %130, %cst_70 [0] : vector<24x128xf32> to vector<128xf32>
    %132 = vector.shape_cast %131 : vector<128xf32> to vector<1x128xf32>
    %cst_71 = arith.constant 2.400000e+01 : f32
    %133 = vector.broadcast %cst_71 : f32 to vector<1x128xf32>
    %134 = arith.divf %132, %133 : vector<1x128xf32>
    %cst_72 = arith.constant 9.99999974E-6 : f32
    %135 = vector.broadcast %cst_72 : f32 to vector<1x128xf32>
    %136 = arith.addf %134, %135 : vector<1x128xf32>
    %137 = math.rsqrt %136 : vector<1x128xf32>
    %138 = vector.broadcast %137 : vector<1x128xf32> to vector<24x128xf32>
    %139 = arith.mulf %129, %138 : vector<24x128xf32>
    %cst_73 = arith.constant 0.000000e+00 : f32
    %140 = vector.broadcast %cst_73 : f32 to vector<24x128xf32>
    %141 = arith.cmpf oge, %139, %140 : vector<24x128xf32>
    %cst_74 = arith.constant 2.000000e-01 : f32
    %142 = vector.broadcast %cst_74 : f32 to vector<24x128xf32>
    %143 = arith.mulf %142, %139 : vector<24x128xf32>
    %144 = arith.select %141, %139, %143 : vector<24x128xi1>, vector<24x128xf32>
    %145 = tpu.iota {dimensions = array<i32: 0>} : vector<51x24xi32>
    %146 = tpu.iota {dimensions = array<i32: 1>} : vector<51x24xi32>
    %c2_i32_75 = arith.constant 2 : i32
    %147 = vector.broadcast %c2_i32_75 : i32 to vector<51x24xi32>
    %148 = arith.muli %147, %146 : vector<51x24xi32>
    %c2_i32_76 = arith.constant 2 : i32
    %149 = vector.broadcast %c2_i32_76 : i32 to vector<51x24xi32>
    %150 = arith.addi %149, %148 : vector<51x24xi32>
    %151 = arith.cmpi eq, %145, %150 : vector<51x24xi32>
    %152 = arith.extui %151 : vector<51x24xi1> to vector<51x24xi32>
    %153 = arith.sitofp %152 : vector<51x24xi32> to vector<51x24xf32>
    %cst_77 = arith.constant dense<0.000000e+00> : vector<51x128xf32>
    %154 = tpu.matmul %153, %144, %cst_77 {dimension_numbers = #tpu.dot_dimension_numbers<[1], [0], [0], [1], [0, 0, 1, 1], [], []>} : vector<51x24xf32>, vector<24x128xf32>, vector<51x128xf32> -> vector<51x128xf32>
    %155 = vector.extract_strided_slice %154 {offsets = [0, 0], sizes = [48, 128], strides = [1, 1]} : vector<51x128xf32> to vector<48x128xf32>
    %c0_78 = arith.constant 0 : index
    %c0_79 = arith.constant 0 : index
    %c0_80 = arith.constant 0 : index
    %156 = vector.load %arg6[%c0_78, %c0_79, %c0_80] : memref<4x128x64xf32, #tpu.memory_space<vmem>>, vector<1x128x64xf32>
    %157 = vector.shape_cast %156 : vector<1x128x64xf32> to vector<128x64xf32>
    %cst_81 = arith.constant dense<0.000000e+00> : vector<48x64xf32>
    %158 = tpu.matmul %155, %157, %cst_81 {dimension_numbers = #tpu.dot_dimension_numbers<[1], [0], [0], [1], [0, 0, 1, 1], [], []>} : vector<48x128xf32>, vector<128x64xf32>, vector<48x64xf32> -> vector<48x64xf32>
    %159 = vector.extract_strided_slice %154 {offsets = [1, 0], sizes = [48, 128], strides = [1, 1]} : vector<51x128xf32> to vector<48x128xf32>
    %c1_82 = arith.constant 1 : index
    %c0_83 = arith.constant 0 : index
    %c0_84 = arith.constant 0 : index
    %160 = vector.load %arg6[%c1_82, %c0_83, %c0_84] : memref<4x128x64xf32, #tpu.memory_space<vmem>>, vector<1x128x64xf32>
    %161 = vector.shape_cast %160 : vector<1x128x64xf32> to vector<128x64xf32>
    %cst_85 = arith.constant dense<0.000000e+00> : vector<48x64xf32>
    %162 = tpu.matmul %159, %161, %cst_85 {dimension_numbers = #tpu.dot_dimension_numbers<[1], [0], [0], [1], [0, 0, 1, 1], [], []>} : vector<48x128xf32>, vector<128x64xf32>, vector<48x64xf32> -> vector<48x64xf32>
    %163 = arith.addf %158, %162 : vector<48x64xf32>
    %164 = vector.extract_strided_slice %154 {offsets = [2, 0], sizes = [48, 128], strides = [1, 1]} : vector<51x128xf32> to vector<48x128xf32>
    %c2_86 = arith.constant 2 : index
    %c0_87 = arith.constant 0 : index
    %c0_88 = arith.constant 0 : index
    %165 = vector.load %arg6[%c2_86, %c0_87, %c0_88] : memref<4x128x64xf32, #tpu.memory_space<vmem>>, vector<1x128x64xf32>
    %166 = vector.shape_cast %165 : vector<1x128x64xf32> to vector<128x64xf32>
    %cst_89 = arith.constant dense<0.000000e+00> : vector<48x64xf32>
    %167 = tpu.matmul %164, %166, %cst_89 {dimension_numbers = #tpu.dot_dimension_numbers<[1], [0], [0], [1], [0, 0, 1, 1], [], []>} : vector<48x128xf32>, vector<128x64xf32>, vector<48x64xf32> -> vector<48x64xf32>
    %168 = arith.addf %163, %167 : vector<48x64xf32>
    %169 = vector.extract_strided_slice %154 {offsets = [3, 0], sizes = [48, 128], strides = [1, 1]} : vector<51x128xf32> to vector<48x128xf32>
    %c3_90 = arith.constant 3 : index
    %c0_91 = arith.constant 0 : index
    %c0_92 = arith.constant 0 : index
    %170 = vector.load %arg6[%c3_90, %c0_91, %c0_92] : memref<4x128x64xf32, #tpu.memory_space<vmem>>, vector<1x128x64xf32>
    %171 = vector.shape_cast %170 : vector<1x128x64xf32> to vector<128x64xf32>
    %cst_93 = arith.constant dense<0.000000e+00> : vector<48x64xf32>
    %172 = tpu.matmul %169, %171, %cst_93 {dimension_numbers = #tpu.dot_dimension_numbers<[1], [0], [0], [1], [0, 0, 1, 1], [], []>} : vector<48x128xf32>, vector<128x64xf32>, vector<48x64xf32> -> vector<48x64xf32>
    %173 = arith.addf %168, %172 : vector<48x64xf32>
    %c0_94 = arith.constant 0 : index
    %c0_95 = arith.constant 0 : index
    %174 = vector.load %arg7[%c0_94, %c0_95] : memref<1x64xf32, #tpu.memory_space<vmem>>, vector<1x64xf32>
    %175 = vector.broadcast %174 : vector<1x64xf32> to vector<48x64xf32>
    %176 = arith.addf %173, %175 : vector<48x64xf32>
    %cst_96 = arith.constant dense<0.000000e+00> : vector<64xf32>
    %177 = vector.multi_reduction <add>, %176, %cst_96 [0] : vector<48x64xf32> to vector<64xf32>
    %178 = vector.shape_cast %177 : vector<64xf32> to vector<1x64xf32>
    %cst_97 = arith.constant 4.800000e+01 : f32
    %179 = vector.broadcast %cst_97 : f32 to vector<1x64xf32>
    %180 = arith.divf %178, %179 : vector<1x64xf32>
    %181 = vector.broadcast %180 : vector<1x64xf32> to vector<48x64xf32>
    %182 = arith.subf %176, %181 : vector<48x64xf32>
    %183 = arith.mulf %182, %182 : vector<48x64xf32>
    %cst_98 = arith.constant dense<0.000000e+00> : vector<64xf32>
    %184 = vector.multi_reduction <add>, %183, %cst_98 [0] : vector<48x64xf32> to vector<64xf32>
    %185 = vector.shape_cast %184 : vector<64xf32> to vector<1x64xf32>
    %cst_99 = arith.constant 4.800000e+01 : f32
    %186 = vector.broadcast %cst_99 : f32 to vector<1x64xf32>
    %187 = arith.divf %185, %186 : vector<1x64xf32>
    %cst_100 = arith.constant 9.99999974E-6 : f32
    %188 = vector.broadcast %cst_100 : f32 to vector<1x64xf32>
    %189 = arith.addf %187, %188 : vector<1x64xf32>
    %190 = math.rsqrt %189 : vector<1x64xf32>
    %191 = vector.broadcast %190 : vector<1x64xf32> to vector<48x64xf32>
    %192 = arith.mulf %182, %191 : vector<48x64xf32>
    %cst_101 = arith.constant 0.000000e+00 : f32
    %193 = vector.broadcast %cst_101 : f32 to vector<48x64xf32>
    %194 = arith.cmpf oge, %192, %193 : vector<48x64xf32>
    %cst_102 = arith.constant 2.000000e-01 : f32
    %195 = vector.broadcast %cst_102 : f32 to vector<48x64xf32>
    %196 = arith.mulf %195, %192 : vector<48x64xf32>
    %197 = arith.select %194, %192, %196 : vector<48x64xi1>, vector<48x64xf32>
    %198 = tpu.iota {dimensions = array<i32: 0>} : vector<99x48xi32>
    %199 = tpu.iota {dimensions = array<i32: 1>} : vector<99x48xi32>
    %c2_i32_103 = arith.constant 2 : i32
    %200 = vector.broadcast %c2_i32_103 : i32 to vector<99x48xi32>
    %201 = arith.muli %200, %199 : vector<99x48xi32>
    %c2_i32_104 = arith.constant 2 : i32
    %202 = vector.broadcast %c2_i32_104 : i32 to vector<99x48xi32>
    %203 = arith.addi %202, %201 : vector<99x48xi32>
    %204 = arith.cmpi eq, %198, %203 : vector<99x48xi32>
    %205 = arith.extui %204 : vector<99x48xi1> to vector<99x48xi32>
    %206 = arith.sitofp %205 : vector<99x48xi32> to vector<99x48xf32>
    %cst_105 = arith.constant dense<0.000000e+00> : vector<99x64xf32>
    %207 = tpu.matmul %206, %197, %cst_105 {dimension_numbers = #tpu.dot_dimension_numbers<[1], [0], [0], [1], [0, 0, 1, 1], [], []>} : vector<99x48xf32>, vector<48x64xf32>, vector<99x64xf32> -> vector<99x64xf32>
    %208 = vector.extract_strided_slice %207 {offsets = [0, 0], sizes = [96, 64], strides = [1, 1]} : vector<99x64xf32> to vector<96x64xf32>
    %c0_106 = arith.constant 0 : index
    %c0_107 = arith.constant 0 : index
    %c0_108 = arith.constant 0 : index
    %209 = vector.load %arg8[%c0_106, %c0_107, %c0_108] : memref<4x64x2xf32, #tpu.memory_space<vmem>>, vector<1x64x2xf32>
    %210 = vector.shape_cast %209 : vector<1x64x2xf32> to vector<64x2xf32>
    %cst_109 = arith.constant dense<0.000000e+00> : vector<96x2xf32>
    %211 = tpu.matmul %208, %210, %cst_109 {dimension_numbers = #tpu.dot_dimension_numbers<[1], [0], [0], [1], [0, 0, 1, 1], [], []>} : vector<96x64xf32>, vector<64x2xf32>, vector<96x2xf32> -> vector<96x2xf32>
    %212 = vector.extract_strided_slice %207 {offsets = [1, 0], sizes = [96, 64], strides = [1, 1]} : vector<99x64xf32> to vector<96x64xf32>
    %c1_110 = arith.constant 1 : index
    %c0_111 = arith.constant 0 : index
    %c0_112 = arith.constant 0 : index
    %213 = vector.load %arg8[%c1_110, %c0_111, %c0_112] : memref<4x64x2xf32, #tpu.memory_space<vmem>>, vector<1x64x2xf32>
    %214 = vector.shape_cast %213 : vector<1x64x2xf32> to vector<64x2xf32>
    %cst_113 = arith.constant dense<0.000000e+00> : vector<96x2xf32>
    %215 = tpu.matmul %212, %214, %cst_113 {dimension_numbers = #tpu.dot_dimension_numbers<[1], [0], [0], [1], [0, 0, 1, 1], [], []>} : vector<96x64xf32>, vector<64x2xf32>, vector<96x2xf32> -> vector<96x2xf32>
    %216 = arith.addf %211, %215 : vector<96x2xf32>
    %217 = vector.extract_strided_slice %207 {offsets = [2, 0], sizes = [96, 64], strides = [1, 1]} : vector<99x64xf32> to vector<96x64xf32>
    %c2_114 = arith.constant 2 : index
    %c0_115 = arith.constant 0 : index
    %c0_116 = arith.constant 0 : index
    %218 = vector.load %arg8[%c2_114, %c0_115, %c0_116] : memref<4x64x2xf32, #tpu.memory_space<vmem>>, vector<1x64x2xf32>
    %219 = vector.shape_cast %218 : vector<1x64x2xf32> to vector<64x2xf32>
    %cst_117 = arith.constant dense<0.000000e+00> : vector<96x2xf32>
    %220 = tpu.matmul %217, %219, %cst_117 {dimension_numbers = #tpu.dot_dimension_numbers<[1], [0], [0], [1], [0, 0, 1, 1], [], []>} : vector<96x64xf32>, vector<64x2xf32>, vector<96x2xf32> -> vector<96x2xf32>
    %221 = arith.addf %216, %220 : vector<96x2xf32>
    %222 = vector.extract_strided_slice %207 {offsets = [3, 0], sizes = [96, 64], strides = [1, 1]} : vector<99x64xf32> to vector<96x64xf32>
    %c3_118 = arith.constant 3 : index
    %c0_119 = arith.constant 0 : index
    %c0_120 = arith.constant 0 : index
    %223 = vector.load %arg8[%c3_118, %c0_119, %c0_120] : memref<4x64x2xf32, #tpu.memory_space<vmem>>, vector<1x64x2xf32>
    %224 = vector.shape_cast %223 : vector<1x64x2xf32> to vector<64x2xf32>
    %cst_121 = arith.constant dense<0.000000e+00> : vector<96x2xf32>
    %225 = tpu.matmul %222, %224, %cst_121 {dimension_numbers = #tpu.dot_dimension_numbers<[1], [0], [0], [1], [0, 0, 1, 1], [], []>} : vector<96x64xf32>, vector<64x2xf32>, vector<96x2xf32> -> vector<96x2xf32>
    %226 = arith.addf %221, %225 : vector<96x2xf32>
    %c0_122 = arith.constant 0 : index
    %c0_123 = arith.constant 0 : index
    %227 = vector.load %arg9[%c0_122, %c0_123] : memref<1x2xf32, #tpu.memory_space<vmem>>, vector<1x2xf32>
    %228 = vector.broadcast %227 : vector<1x2xf32> to vector<96x2xf32>
    %229 = arith.addf %226, %228 : vector<96x2xf32>
    %230 = math.tanh %229 : vector<96x2xf32>
    %c0_124 = arith.constant 0 : index
    %c0_125 = arith.constant 0 : index
    %c0_126 = arith.constant 0 : index
    %231 = vector.load %arg10[%c0_124, %c0_125, %c0_126] : memref<1x96x2xf32, #tpu.memory_space<vmem>>, vector<1x96x2xf32>
    %232 = vector.shape_cast %231 : vector<1x96x2xf32> to vector<96x2xf32>
    %233 = vector.shape_cast %230 : vector<96x2xf32> to vector<1x96x2xf32>
    tpu.vector_store %arg10[%c0_124, %c0_125, %c0_126], %233 {strides = array<i32>} : memref<1x96x2xf32, #tpu.memory_space<vmem>>, vector<1x96x2xf32>,
    return
  }
  func.func @transform_0(%arg0: i32) -> (i32, i32, i32) {
    %c0_i32 = arith.constant 0 : i32
    %c0_i32_0 = arith.constant 0 : i32
    %c0_i32_1 = arith.constant 0 : i32
    return %arg0, %c0_i32, %c0_i32_0 : i32, i32, i32
  }
  func.func @transform_1(%arg0: i32) -> (i32, i32, i32) {
    %c0_i32 = arith.constant 0 : i32
    %c0_i32_0 = arith.constant 0 : i32
    %c0_i32_1 = arith.constant 0 : i32
    %c0_i32_2 = arith.constant 0 : i32
    return %c0_i32, %c0_i32_0, %c0_i32_1 : i32, i32, i32
  }
  func.func @transform_2(%arg0: i32) -> (i32, i32) {
    %c0_i32 = arith.constant 0 : i32
    %c0_i32_0 = arith.constant 0 : i32
    %c0_i32_1 = arith.constant 0 : i32
    return %c0_i32, %c0_i32_0 : i32, i32
  }
  func.func @transform_3(%arg0: i32) -> (i32, i32, i32) {
    %c0_i32 = arith.constant 0 : i32
    %c0_i32_0 = arith.constant 0 : i32
    %c0_i32_1 = arith.constant 0 : i32
    %c0_i32_2 = arith.constant 0 : i32
    return %c0_i32, %c0_i32_0, %c0_i32_1 : i32, i32, i32
  }
  func.func @transform_4(%arg0: i32) -> (i32, i32) {
    %c0_i32 = arith.constant 0 : i32
    %c0_i32_0 = arith.constant 0 : i32
    %c0_i32_1 = arith.constant 0 : i32
    return %c0_i32, %c0_i32_0 : i32, i32
  }
  func.func @transform_5(%arg0: i32) -> (i32, i32, i32) {
    %c0_i32 = arith.constant 0 : i32
    %c0_i32_0 = arith.constant 0 : i32
    %c0_i32_1 = arith.constant 0 : i32
    %c0_i32_2 = arith.constant 0 : i32
    return %c0_i32, %c0_i32_0, %c0_i32_1 : i32, i32, i32
  }
  func.func @transform_6(%arg0: i32) -> (i32, i32) {
    %c0_i32 = arith.constant 0 : i32
    %c0_i32_0 = arith.constant 0 : i32
    %c0_i32_1 = arith.constant 0 : i32
    return %c0_i32, %c0_i32_0 : i32, i32
  }
  func.func @transform_7(%arg0: i32) -> (i32, i32, i32) {
    %c0_i32 = arith.constant 0 : i32
    %c0_i32_0 = arith.constant 0 : i32
    %c0_i32_1 = arith.constant 0 : i32
    %c0_i32_2 = arith.constant 0 : i32
    return %c0_i32, %c0_i32_0, %c0_i32_1 : i32, i32, i32
  }
  func.func @transform_8(%arg0: i32) -> (i32, i32) {
    %c0_i32 = arith.constant 0 : i32
    %c0_i32_0 = arith.constant 0 : i32
    %c0_i32_1 = arith.constant 0 : i32
    return %c0_i32, %c0_i32_0 : i32, i32
  }
  func.func @transform_9(%arg0: i32) -> (i32, i32, i32) {
    %c0_i32 = arith.constant 0 : i32
    %c0_i32_0 = arith.constant 0 : i32
    %c0_i32_1 = arith.constant 0 : i32
    return %arg0, %c0_i32, %c0_i32_0 : i32, i32, i32
  }
}

</mosaic_0001>

<bundles_post_ra>
// kernel: generator_forward.1
= control target key start
LH: loop header
LB: loop body
LE: loop exit
PB: predicated region body
PF: predicated region fallthrough
CT: control target
= control target key end

     0   :  { %s3385_s30 = smov 0   ;;  %s4665_s0 = inlined_call_operand.vmem [shape: f32[2,1,5], index: 0, kind: input, shape index: {}]   ;;  %s4666_s1 = inlined_call_operand.vmem [shape: f32[12,5,256], index: 1, kind: input, shape index: {}]   ;;  %s4667_s2 = inlined_call_operand.vmem [shape: f32[1,256], index: 2, kind: input, shape index: {}]   ;;  %s4668_s3 = inlined_call_operand.vmem [shape: f32[4,256,128], index: 3, kind: input, shape index: {}]   ;;  %s4669_s4 = inlined_call_operand.vmem [shape: f32[1,128], index: 4, kind: input, shape index: {}]   ;;  %s4670_s5 = inlined_call_operand.vmem [shape: f32[4,128,64], index: 5, kind: input, shape index: {}]   ;;  %s4671_s6 = inlined_call_operand.vmem [shape: f32[1,64], index: 6, kind: input, shape index: {}]   ;;  %s4672_s7 = inlined_call_operand.vmem [shape: f32[4,64,2], index: 7, kind: input, shape index: {}]   ;;  %s4673_s8 = inlined_call_operand.vmem [shape: f32[1,2], index: 8, kind: input, shape index: {}]   ;;  %s4674_s9 = inlined_call_operand.vmem [shape: f32[2,96,2], index: 9, kind: output, shape index: {}]  }
   0x1 LB: > { %s2910_s10 = sadd.s32 4294967295, %s3329_s30   ;;  %p2914_p0 = scmp.ge.s32.totalorder %s3329_s30, 1  ;;  %s3329_s30 = sphi %s3385_s30, %s19_s30  }
   0x2   : > { %p285_p1 = scmp.lt.s32.totalorder %s3329_s30, 3 }
   0x4   : > { %p286_p2 = pnand %p2914_p0, %p285_p1 }
   0x5   : > { %p319_p3 = scmp.lt.s32.totalorder (!%p286_p2), %s2910_s10, 1 }
   0x6   : > { %289 = sbr.rel (%p286_p2) target bundleno = 1541 (0x605), region = 56 }
   0xb   : > { %v341_v0 = vld [vmem:[%s4666_s1] sm:$0x1f]  ;;  %vm357_vm0 = vcmask 1044480   ;;  %v328_v1 = vlaneseq  ;;  %v2916_v2 = vld [vmem:[%s4666_s1 + $0x10] sm:$0x1f]  ;;  %v3331_v4 = vmov 0.0  }
   0xc   : > { %2924 = vmatpush.msk.msra.mxu2 %vm357_vm0, %v341_v0  ;;  %v2928_v3 = vld [vmem:[%s4666_s1 + $0x20] sm:$0x1f]  ;;  %s4676_s10 = smov (!%p319_p3, %s2910_s10), 1  ;;  %2918 = vmatpush.msk.msra.mxu1 %vm357_vm0, %v2916_v2  ;;  %v2936_v6 = vld [vmem:[%s4666_s1 + $0x30] sm:$0x1f]  ;;  %vm352_vm1 = vcmask 39936  }
   0xd   : > { %436 = vmatmul.f32.vlgmr.msra.gmra.mxu2 %v3331_v4  ;;  %v3407_v5 = vshrl.u32 %v328_v1, 7  ;;  %2930 = vmatpush.msk.msra.mxu0 %vm357_vm0, %v2928_v3  ;;  %v342_v7 = vld [vmem:[%s4666_s1 + $0x8] sm:$0x1f]  ;;  %v2944_v8 = vld [vmem:[%s4666_s1 + $0x40] sm:$0x1f]  ;;  %s321_s25 = scalar_lea.vmem %s4665_s0, %s4676_s10  ;;  %vm348_vm3 = vcmask 1046528  }
   0xe   : > { %2938 = vmatpush.msk.msrb.mxu2 %vm357_vm0, %v2936_v6  ;;  %2926 = vmatpush.msk.msra.mxu3 %vm357_vm0, %v342_v7  ;;  %v2917_v10 = vld [vmem:[%s4666_s1 + $0x18] sm:$0x1f]  ;;  %v3281_v11 = vld [vmem:[%s321_s25] ss:$0 sm:$0xff]  ;;  %v2952_v12 = vld [vmem:[%s4666_s1 + $0x50] sm:$0x1f] }
   0xf   : > { %v3426_v9 = vadd.s32 8, %v3407_v5  ;;  %2946 = vmatpush.msk.msrb.mxu0 %vm357_vm0, %v2944_v8  ;;  %459 = vmatmul.f32.vlgmr.msra.gmra.mxu3 %v3331_v4  ;;  %v3440_v13 = vrot.slane %v3331_v4, 1  ;;  %v3443_v14 = vrot.slane %v3331_v4, 2  ;;  %vm469_vm4 = vcmask 1045504   ;;  %v2960_v18 = vld [vmem:[%s4666_s1 + $0x60] sm:$0x1f] }
  0x10   : > { %2921 = vmatpush.msk.msrb.mxu1 %vm357_vm0, %v2917_v10  ;;  %2954 = vmatpush.msk.msra.mxu2 %vm357_vm0, %v2952_v12  ;;  %v3471_v21 = vrot.slane %v3331_v4, 3  ;;  %v2937_v23 = vld [vmem:[%s4666_s1 + $0x38] sm:$0x1f]  ;;  %v603_v24 = vrot.slane %v3331_v4, 4  ;;  %vm602_vm5 = vcmask 1043456   ;;  %v671_v31 = vrot.slane %v3331_v4, 5 }
  0x11   : > { %vm333_vm2 = vcmp.eq.s32.totalorder %v3426_v9, 11  ;;  %2941 = vmatpush.msk.msrb.mxu3 %vm357_vm0, %v2937_v23  ;;  %v2968_v28 = vld [vmem:[%s4666_s1 + $0x70] sm:$0x1f]  ;;  %v2976_v29 = vld [vmem:[%s4666_s1 + $0x80] sm:$0x1f]  ;;  %vm670_vm6 = vcmask 1042432  }
  0x12   : > { %v3446_v15 = vsel %vm333_vm2, %v3281_v11, 0.0  ;;  %v2929_v30 = vld [vmem:[%s4666_s1 + $0x28] sm:$0x1f]  ;;  %v2953_v33 = vld [vmem:[%s4666_s1 + $0x58] sm:$0x1f]  ;;  %v740_v34 = vrot.slane %v3331_v4, 6 }
  0x13   : > { %v3449_v16 = vrot.slane %v3446_v15, 1  ;;  %v3452_v17 = vrot.slane %v3446_v15, 2  ;;  %v3474_v22 = vrot.slane %v3446_v15, 3  ;;  %v3481_v25 = vrot.slane %v3446_v15, 4  ;;  %2957 = vmatpush.msk.msra.mxu3 %vm357_vm0, %v2953_v33  ;;  %v2982_v38 = vld [vmem:[%s4666_s1 + $0x90] sm:$0x1f] }
  0x14   : > { %v672_v32 = vrot.slane %v3446_v15, 5  ;;  %v741_v35 = vrot.slane %v3446_v15, 6  ;;  %vm739_vm7 = vcmask 1041408   ;;  %v2990_v39 = vld [vmem:[%s4666_s1 + $0xa0] sm:$0x1f]  ;;  %v809_v43 = vrot.slane %v3331_v4, 7 }
  0x15   : > { %2925 = vmatmul.msk.f32.gmra.mxu2 %vm352_vm1, %v3446_v15  ;;  %v351_v19 = vsel %vm348_vm3, %v3440_v13, %v3449_v16  ;;  %v3465_v20 = vsel %vm469_vm4, %v3443_v14, %v3452_v17  ;;  %v538_v26 = vsel %vm357_vm0, %v3471_v21, %v3474_v22  ;;  %v3493_v27 = vsel %vm602_vm5, %v603_v24, %v3481_v25  ;;  %v2945_v42 = vld [vmem:[%s4666_s1 + $0x48] sm:$0x1f]  ;;  %v2969_v45 = vld [vmem:[%s4666_s1 + $0x78] sm:$0x1f]  ;;  %v2998_v47 = vld [vmem:[%s4666_s1 + $0xb0] sm:$0x1f] }
  0x16   : > { %2919 = vmatmul.msk.f32.vlgmr.msra.gmra.mxu1 %vm352_vm1, %v351_v19  ;;  %2931 = vmatmul.msk.f32.vlgmr.msra.gmra.mxu0 %vm352_vm1, %v3465_v20  ;;  %v673_v36 = vsel %vm670_vm6, %v671_v31, %v672_v32  ;;  %v742_v37 = vsel %vm739_vm7, %v740_v34, %v741_v35  ;;  %v675_v40 = vsel %vm670_vm6, %v672_v32, %v671_v31  ;;  %v810_v44 = vrot.slane %v3446_v15, 7  ;;  %v2961_v48 = vld [vmem:[%s4666_s1 + $0x68] sm:$0x1f]  ;;  %v2983_v50 = vld [vmem:[%s4666_s1 + $0x98] sm:$0x1f]  ;;  %s3268_s24 = smul.u32 96, %s4676_s10 }
  0x17   : > { %2962 = vmatpush.msk.msra.mxu0 %vm357_vm0, %v2960_v18  ;;  %3267 = vmatpush.msk.msra.mxu1 %vm357_vm0, %v2928_v3  ;;  %v744_v41 = vsel %vm739_vm7, %v741_v35, %v740_v34  ;;  %vm808_vm8 = vcmask 1040384   ;;  %v939_v51 = vsel %vm348_vm3, %v3449_v16, %v3440_v13  ;;  %v1004_v52 = vsel %vm469_vm4, %v3452_v17, %v3443_v14  ;;  %v2977_v53 = vld [vmem:[%s4666_s1 + $0x88] sm:$0x1f]  ;;  %v2999_v54 = vld [vmem:[%s4666_s1 + $0xb8] sm:$0x1f] }
  0x18   : > { %2927 = vmatmul.msk.f32.gmra.mxu3 %vm352_vm1, %v3446_v15  ;;  %v811_v46 = vsel %vm808_vm8, %v809_v43, %v810_v44  ;;  %v813_v49 = vsel %vm808_vm8, %v810_v44, %v809_v43  ;;  %v1069_v55 = vsel %vm357_vm0, %v3474_v22, %v3471_v21  ;;  %v2991_v56 = vld [vmem:[%s4666_s1 + $0xa8] sm:$0x1f]  ;;  %s4625_s27 = scalar_lea.vmem %s4674_s9, %s3268_s24 }
  0x1d   : > { %2939 = vmatmul.msk.f32.vlgmr.msrb.gmra.mxu2 %vm352_vm1, %v538_v26 }
  0x1e   : > { %2920 = vmatmul.msk.f32.gmra.mxu1 %vm352_vm1, %v3449_v16  ;;  %2947 = vmatmul.msk.f32.vlgmr.msrb.gmra.mxu0 %vm352_vm1, %v3493_v27 }
  0x1f   : > { %2970 = vmatpush.msk.msrb.mxu2 %vm357_vm0, %v2968_v28  ;;  %2978 = vmatpush.msk.msrb.mxu0 %vm357_vm0, %v2976_v29 }
  0x20   : > { %2942 = vmatmul.msk.f32.vlgmr.msrb.gmra.mxu3 %vm352_vm1, %v538_v26 }
  0x21   : > { %2973 = vmatpush.msk.msrb.mxu3 %vm357_vm0, %v2969_v45 }
  0x25   : > { %2940 = vmatmul.msk.f32.gmra.mxu2 %vm352_vm1, %v3474_v22 }
  0x26   : > { %2922 = vmatmul.msk.f32.vlgmr.msrb.gmra.mxu1 %vm352_vm1, %v351_v19  ;;  %2948 = vmatmul.msk.f32.gmra.mxu0 %vm352_vm1, %v3481_v25 }
  0x27   : > { %2933 = vmatpush.msk.msrb.mxu1 %vm357_vm0, %v2929_v30 }
  0x28   : > { %2943 = vmatmul.msk.f32.gmra.mxu3 %vm352_vm1, %v3474_v22 }
  0x2d   : > { %2955 = vmatmul.msk.f32.vlgmr.msra.gmra.mxu2 %vm352_vm1, %v673_v36 }
  0x2e   : > { %2923 = vmatmul.msk.f32.gmra.mxu1 %vm352_vm1, %v3449_v16  ;;  %2963 = vmatmul.msk.f32.vlgmr.msra.gmra.mxu0 %vm352_vm1, %v742_v37 }
  0x2f   : > { %2984 = vmatpush.msk.msra.mxu2 %vm357_vm0, %v2982_v38  ;;  %2992 = vmatpush.msk.msra.mxu0 %vm357_vm0, %v2990_v39 }
  0x30   : > { %2958 = vmatmul.msk.f32.vlgmr.msra.gmra.mxu3 %vm352_vm1, %v673_v36 }
  0x31   : > { %2987 = vmatpush.msk.msra.mxu3 %vm357_vm0, %v2983_v50 }
  0x35   : > { %2956 = vmatmul.msk.f32.gmra.mxu2 %vm352_vm1, %v675_v40 }
  0x36   : > { %2932 = vmatmul.msk.f32.vlgmr.msra.gmra.mxu1 %vm352_vm1, %v3452_v17  ;;  %2964 = vmatmul.msk.f32.gmra.mxu0 %vm352_vm1, %v744_v41 }
  0x37   : > { %2949 = vmatpush.msk.msra.mxu1 %vm357_vm0, %v2945_v42 }
  0x38   : > { %2959 = vmatmul.msk.f32.gmra.mxu3 %vm352_vm1, %v675_v40 }
  0x3d   : > { %2971 = vmatmul.msk.f32.vlgmr.msrb.gmra.mxu2 %vm352_vm1, %v811_v46 }
  0x3e   : > { %2934 = vmatmul.msk.f32.vlgmr.msrb.gmra.mxu1 %vm352_vm1, %v3465_v20  ;;  %2979 = vmatmul.msk.f32.vlgmr.msrb.gmra.mxu0 %vm352_vm1, %v3446_v15 }
  0x3f   : > { %3000 = vmatpush.msk.msrb.mxu2 %vm357_vm0, %v2998_v47  ;;  %2965 = vmatpush.msk.msrb.mxu1 %vm357_vm0, %v2961_v48 }
  0x40   : > { %2974 = vmatmul.msk.f32.vlgmr.msrb.gmra.mxu3 %vm352_vm1, %v811_v46 }
  0x41   : > { %3003 = vmatpush.msk.msrb.mxu3 %vm357_vm0, %v2999_v54 }
  0x45   : > { %2972 = vmatmul.msk.f32.gmra.mxu2 %vm352_vm1, %v813_v49 }
  0x46   : > { %2935 = vmatmul.msk.f32.gmra.mxu1 %vm352_vm1, %v3452_v17  ;;  %904 = vmatmul.f32.gmra.mxu0 %v3331_v4 }
  0x48   : > { %2975 = vmatmul.msk.f32.gmra.mxu3 %vm352_vm1, %v813_v49  ;;  %v3332_v49 = vmov 12.0  }
  0x49   : > { %3285 = vrcp.f32 %v3332_v49 }
  0x4d   : > { %2985 = vmatmul.msk.f32.vlgmr.msra.gmra.mxu2 %vm352_vm1, %v939_v51 }
  0x4e   : > { %2950 = vmatmul.msk.f32.vlgmr.msra.gmra.mxu1 %vm352_vm1, %v3493_v27  ;;  %2993 = vmatmul.msk.f32.vlgmr.msra.gmra.mxu0 %vm352_vm1, %v1004_v52 }
  0x4f   : > { %2980 = vmatpush.msk.msra.mxu1 %vm357_vm0, %v2977_v53 }
  0x50   : > { %2988 = vmatmul.msk.f32.vlgmr.msra.gmra.mxu3 %vm352_vm1, %v939_v51 }
  0x55   : > { %2986 = vmatmul.msk.f32.gmra.mxu2 %vm352_vm1, %v3440_v13 }
  0x56   : > { %2951 = vmatmul.msk.f32.gmra.mxu1 %vm352_vm1, %v3481_v25  ;;  %2994 = vmatmul.msk.f32.gmra.mxu0 %vm352_vm1, %v3443_v14 }
  0x58   : > { %2989 = vmatmul.msk.f32.gmra.mxu3 %vm352_vm1, %v3440_v13 }
  0x5d   : > { %3001 = vmatmul.msk.f32.vlgmr.msrb.gmra.mxu2 %vm352_vm1, %v1069_v55 }
  0x5e   : > { %2966 = vmatmul.msk.f32.vlgmr.msrb.gmra.mxu1 %vm352_vm1, %v742_v37 }
  0x5f   : > { %2995 = vmatpush.msk.msrb.mxu1 %vm357_vm0, %v2991_v56 }
  0x60   : > { %3004 = vmatmul.msk.f32.vlgmr.msrb.gmra.mxu3 %vm352_vm1, %v1069_v55  ;;  %v3642_v55 = vld [vmem:[%s4667_s2] sm:$0x3] }
  0x65   : > { %3002 = vmatmul.msk.f32.gmra.mxu2 %vm352_vm1, %v3471_v21 }
  0x66   : > { %2967 = vmatmul.msk.f32.gmra.mxu1 %vm352_vm1, %v744_v41 }
  0x68   : > { %3005 = vmatmul.msk.f32.gmra.mxu3 %vm352_vm1, %v3471_v21 }
  0x6e   : > { %2981 = vmatmul.msk.f32.vlgmr.msra.gmra.mxu1 %vm352_vm1, %v3446_v15 }
  0x76   : > { %927 = vmatmul.f32.gmra.mxu1 %v3331_v4 }
  0x7e   : > { %2996 = vmatmul.msk.f32.vlgmr.msrb.gmra.mxu1 %vm352_vm1, %v1004_v52 }
  0x86   : > { %2997 = vmatmul.msk.f32.gmra.mxu1 %vm352_vm1, %v3443_v14  ;;  %vm1246_vm1 = vcmask 97280  }
  0x90   : > { %v437_v57 = vpop.f32.mrf.mxu2 }
  0x92   : > { %v460_v60 = vpop.f32.mrf.mxu3 }
  0x93   : > { %v381_v58 = vpop.f32.mrf.mxu1  ;;  %v500_v59 = vpop.f32.mrf.mxu0 }
  0x94   : > { %v438_v25 = vadd.f32 %v437_v57, %v381_v58  ;;  %v3286_v57 = vpop.eup %3285 }
  0x95   : > { %vm1161_vm9 = vweird.f32 %v3286_v57 }
  0x96   : > { %v529_v28 = vadd.f32 %v500_v59, %v438_v25 }
  0x98   : > { %v440_v61 = vpop.f32.mrf.mxu2 }
  0x9b   : > { %v384_v62 = vpop.f32.mrf.mxu1  ;;  %v633_v63 = vpop.f32.mrf.mxu0 }
  0x9c   : > { %v3629_v2 = vpop.f32.mrf.mxu3  ;;  %v441_v24 = vadd.f32 %v440_v61, %v384_v62 }
  0xa0   : > { %v566_v0 = vpop.f32.mrf.mxu2 }
  0xa1   : > { %v595_v30 = vadd.f32 %v566_v0, %v529_v28 }
  0xa3   : > { %v404_v3 = vpop.f32.mrf.mxu1  ;;  %v636_v7 = vpop.f32.mrf.mxu0  ;;  %v662_v36 = vadd.f32 %v633_v63, %v595_v30  ;;  %v1132_v63 = vperm.slane %v3642_v55, 0 }
  0xa4   : > { %v3631_v8 = vpop.f32.mrf.mxu3  ;;  %v461_v59 = vadd.f32 %v460_v60, %v404_v3 }
  0xa8   : > { %v569_v6 = vpop.f32.mrf.mxu2 }
  0xab   : > { %v407_v10 = vpop.f32.mrf.mxu1  ;;  %v772_v12 = vpop.f32.mrf.mxu0 }
  0xac   : > { %v3633_v14 = vpop.f32.mrf.mxu3 }
  0xb0   : > { %v703_v11 = vpop.f32.mrf.mxu2 }
  0xb1   : > { %v732_v37 = vadd.f32 %v703_v11, %v662_v36  ;;  %v1157_v11 = vmul.f32 12.0, %v3286_v57 }
  0xb3   : > { %v503_v13 = vpop.f32.mrf.mxu1  ;;  %v775_v17 = vpop.f32.mrf.mxu0  ;;  %v801_v40 = vadd.f32 %v772_v12, %v732_v37  ;;  %v464_v12 = vadd.f32 %v3629_v2, %v407_v10 }
  0xb4   : > { %v3635_v18 = vpop.f32.mrf.mxu3  ;;  %v531_v26 = vadd.f32 %v503_v13, %v441_v24  ;;  %v1158_v24 = vsub.f32 1.0, %v1157_v11 }
  0xb6   : > { %v597_v29 = vadd.f32 %v569_v6, %v531_v26 }
  0xb8   : > { %v706_v15 = vpop.f32.mrf.mxu2  ;;  %v664_v34 = vadd.f32 %v636_v7, %v597_v29 }
  0xba   : > { %v734_v38 = vadd.f32 %v706_v15, %v664_v34 }
  0xbb   : > { %v523_v16 = vpop.f32.mrf.mxu1  ;;  %v902_v21 = vpop.f32.mrf.mxu0 }
  0xbc   : > { %v3637_v22 = vpop.f32.mrf.mxu3  ;;  %v803_v42 = vadd.f32 %v775_v17, %v734_v38  ;;  %v530_v6 = vadd.f32 %v523_v16, %v461_v59  ;;  %v1159_v16 = vmul.f32 %v3286_v57, %v1158_v24 }
  0xc0   : > { %v841_v19 = vpop.f32.mrf.mxu2 }
  0xc1   : > { %v870_v45 = vadd.f32 %v841_v19, %v801_v40 }
  0xc3   : > { %v526_v20 = vpop.f32.mrf.mxu1  ;;  %v905_v31 = vpop.f32.mrf.mxu0  ;;  %v931_v47 = vadd.f32 %v902_v21, %v870_v45  ;;  %v596_v21 = vadd.f32 %v3631_v8, %v530_v6 }
  0xc4   : > { %v864_v33 = vpop.f32.mrf.mxu3  ;;  %v532_v17 = vadd.f32 %v526_v20, %v464_v12 }
  0xc6   : > { %v598_v26 = vadd.f32 %v3633_v14, %v532_v17 }
  0xc8   : > { %v844_v23 = vpop.f32.mrf.mxu2 }
  0xc9   : > { %v872_v46 = vadd.f32 %v844_v23, %v803_v42 }
  0xcb   : > { %v656_v27 = vpop.f32.mrf.mxu1  ;;  %v1032_v41 = vpop.f32.mrf.mxu0  ;;  %v933_v50 = vadd.f32 %v905_v31, %v872_v46 }
  0xcc   : > { %v867_v44 = vpop.f32.mrf.mxu3  ;;  %v663_v3 = vadd.f32 %v656_v27, %v596_v21 }
  0xce   : > { %v733_v2 = vadd.f32 %v3635_v18, %v663_v3 }
  0xd0   : > { %v967_v32 = vpop.f32.mrf.mxu2 }
  0xd1   : > { %v996_v51 = vadd.f32 %v967_v32, %v931_v47  ;;  %v1160_v32 = vadd.f32 %v3286_v57, %v1159_v16 }
  0xd3   : > { %v659_v35 = vpop.f32.mrf.mxu1  ;;  %v1035_v54 = vpop.f32.mrf.mxu0  ;;  %v1061_v58 = vadd.f32 %v1032_v41, %v996_v51  ;;  %v3651_v38 = vsel %vm1161_vm9, %v3286_v57, %v1160_v32 }
  0xd4   : > { %v990_v56 = vpop.f32.mrf.mxu3  ;;  %v665_v29 = vadd.f32 %v659_v35, %v598_v26 }
  0xd6   : > { %v735_v8 = vadd.f32 %v3637_v22, %v665_v29  ;;  %v1231_v29 = vand.u32 127, %v328_v1 }
  0xd8   : > { %v970_v39 = vpop.f32.mrf.mxu2 }
  0xd9   : > { %v998_v52 = vadd.f32 %v970_v39, %v933_v50 }
  0xdb   : > { %v795_v43 = vpop.f32.mrf.mxu1  ;;  %v1063_v61 = vadd.f32 %v1035_v54, %v998_v52 }
  0xdc   : > { %v993_v25 = vpop.f32.mrf.mxu3  ;;  %v802_v20 = vadd.f32 %v795_v43, %v733_v2 }
  0xde   : > { %v871_v27 = vadd.f32 %v864_v33, %v802_v20  ;;  %v1232_v20 = vmul.u32 2, %v1231_v29  ;;  %v1331_v29 = vld [vmem:[%s4668_s3 + $0x40] sm:$0xff] }
  0xe0   : > { %v1097_v48 = vpop.f32.mrf.mxu2 }
  0xe1   : > { %v1126_v62 = vadd.f32 %v1097_v48, %v1061_v58 }
  0xe3   : > { %v798_v53 = vpop.f32.mrf.mxu1  ;;  %v1136_v19 = vadd.f32 %v1132_v63, %v1126_v62 }
  0xe4   : > { %v804_v36 = vadd.f32 %v798_v53, %v735_v8  ;;  %v1120_v14 = vpop.f32.mrf.mxu3 }
  0xe6   : > { %v873_v41 = vadd.f32 %v867_v44, %v804_v36  ;;  %v1133_v44 = vperm.slane %v3642_v55, 1 }
  0xe8   : > { %v1100_v0 = vpop.f32.mrf.mxu2 }
  0xe9   : > { %v1128_v7 = vadd.f32 %v1100_v0, %v1063_v61 }
  0xeb   : > { %v1138_v13 = vadd.f32 %v1132_v63, %v1128_v7  ;;  %v925_v15 = vpop.f32.mrf.mxu1 }
  0xec   : > { %v932_v40 = vadd.f32 %v925_v15, %v871_v27  ;;  %v1123_v52 = vpop.f32.mrf.mxu3 }
  0xed   : > { %v1140_v23 = vsel %vm602_vm5, %v1138_v13, 0.0 }
  0xee   : > { %v1141_v60 = vadd.f32 %v1140_v23, %v1136_v19  ;;  %v997_v46 = vadd.f32 %v990_v56, %v932_v40 }
  0xf0   : > { %v1142_v28 = vrot.slane %v1141_v60, 4 }
  0xf2   : > { %v1143_v30 = vadd.f32 %v1142_v28, %v1141_v60 }
  0xf3   : > { %v928_v10 = vpop.f32.mrf.mxu1 }
  0xf4   : > { %v1144_v31 = vrot.slane %v1143_v30, 2  ;;  %v934_v43 = vadd.f32 %v928_v10, %v873_v41 }
  0xf6   : > { %v1145_v34 = vadd.f32 %v1144_v31, %v1143_v30  ;;  %v999_v50 = vadd.f32 %v993_v25, %v934_v43 }
  0xf8   : > { %v1146_v37 = vrot.slane %v1145_v34, 1 }
  0xfa   : > { %v1147_v39 = vadd.f32 %v1146_v37, %v1145_v34  ;;  %v3661_v37 = vadd.s32 2, %v1232_v20  ;;  %v3025_v20 = vld [vmem:[%s4668_s3 + $0x128] sm:$0xff] }
  0xfb   : > { %v1055_v35 = vpop.f32.mrf.mxu1 }
  0xfc   : > { %v1163_v18 = vmul.f32 %v3651_v38, %v1147_v39  ;;  %v1062_v48 = vadd.f32 %v1055_v35, %v997_v46  ;;  %vm1234_vm14 = vcmp.eq.s32.totalorder %v3407_v5, %v3661_v37  ;;  %vm1235_vm2 = vcmp.eq.s32.totalorder %v3426_v9, %v3661_v37 }
  0xfd   : > { %v1229_v9 = vadd.s32 24, %v3407_v5 }
  0xfe   : > { %v1165_v42 = vsub.f32 %v1136_v19, %v1163_v18  ;;  %v1167_v45 = vsub.f32 %v1138_v13, %v1163_v18  ;;  %v1127_v57 = vadd.f32 %v1120_v14, %v1062_v48  ;;  %v3675_v48 = vsel %vm1235_vm2, 1.0, %v3331_v4 }
  0xff   : > { %vm1237_vm9 = vcmp.eq.s32.totalorder %v1229_v9, %v3661_v37  ;;  %v3049_v9 = vld [vmem:[%s4668_s3 + $0x1e8] sm:$0xff] }
 0x100   : > { %v1169_v47 = vmul.f32 %v1165_v42, %v1165_v42  ;;  %v1171_v22 = vmul.f32 %v1167_v45, %v1167_v45  ;;  %v1137_v63 = vadd.f32 %v1133_v44, %v1127_v57 }
 0x102   : > { %v1173_v49 = vsel %vm602_vm5, %v1171_v22, 0.0 }
 0x103   : > { %v1174_v33 = vadd.f32 %v1173_v49, %v1169_v47  ;;  %v1058_v51 = vpop.f32.mrf.mxu1  ;;  %v3667_v47 = vsel %vm1234_vm14, 1.0, %v3331_v4  ;;  %v331_v49 = vadd.s32 16, %v3407_v5 }
 0x104   : > { %v1064_v53 = vadd.f32 %v1058_v51, %v999_v50 }
 0x105   : > { %v1175_v54 = vrot.slane %v1174_v33, 4  ;;  %vm1236_vm6 = vcmp.eq.s32.totalorder %v331_v49, %v3661_v37  ;;  %v3098_v49 = vld [vmem:[%s4668_s3 + $0x370] sm:$0xff] }
 0x106   : > { %v1129_v58 = vadd.f32 %v1123_v52, %v1064_v53  ;;  %v3682_v51 = vsel %vm1236_vm6, 1.0, %v3331_v4 }
 0x107   : > { %v1176_v59 = vadd.f32 %v1175_v54, %v1174_v33 }
 0x108   : > { %v1139_v61 = vadd.f32 %v1133_v44, %v1129_v58  ;;  %v3689_v58 = vsel %vm1237_vm9, 1.0, %v3331_v4 }
 0x109   : > { %v1177_v62 = vrot.slane %v1176_v59, 2 }
 0x10a   : > { %v1148_v56 = vsel %vm602_vm5, %v1139_v61, 0.0 }
 0x10b   : > { %v1178_v0 = vadd.f32 %v1177_v62, %v1176_v59  ;;  %v1149_v6 = vadd.f32 %v1148_v56, %v1137_v63  ;;  %v3035_v62 = vld [vmem:[%s4668_s3 + $0x178] sm:$0xff]  ;;  %v3034_v56 = vld [vmem:[%s4668_s3 + $0x170] sm:$0xff] }
 0x10c   : > { %1416 = vmatpush.msra.mxu2 %v3035_v62  ;;  %v3095_v62 = vld [vmem:[%s4668_s3 + $0x358] sm:$0xff] }
 0x10d   : > { %v1179_v7 = vrot.slane %v1178_v0, 1  ;;  %v1150_v11 = vrot.slane %v1149_v6, 4 }
 0x10e   : > { %1417 = vmatpush.msra.mxu2 %v3034_v56  ;;  %v1344_v56 = vld [vmem:[%s4668_s3 + $0xa8] sm:$0xff] }
 0x10f   : > { %v1180_v12 = vadd.f32 %v1179_v7, %v1178_v0  ;;  %v1151_v13 = vadd.f32 %v1150_v11, %v1149_v6  ;;  %v3033_v7 = vld [vmem:[%s4668_s3 + $0x168] sm:$0xff] }
 0x110   : > { %v1336_v11 = vld [vmem:[%s4668_s3 + $0x68] sm:$0xff]  ;;  %1418 = vmatpush.msra.mxu2 %v3033_v7  ;;  %v3046_v7 = vld [vmem:[%s4668_s3 + $0x1d0] sm:$0xff] }
 0x111   : > { %v1189_v15 = vmul.f32 %v1180_v12, %v3651_v38  ;;  %v1152_v17 = vrot.slane %v1151_v13, 2 }
 0x113   : > { %v1191_v19 = vadd.f32 1e-05, %v1189_v15  ;;  %v1153_v21 = vadd.f32 %v1152_v17, %v1151_v13  ;;  %v3032_v13 = vld [vmem:[%s4668_s3 + $0x160] sm:$0xff] }
 0x114   : > { %v1335_v15 = vld [vmem:[%s4668_s3 + $0x60] sm:$0xff]  ;;  %1419 = vmatpush.msra.mxu2 %v3032_v13  ;;  %v3093_v13 = vld [vmem:[%s4668_s3 + $0x348] sm:$0xff] }
 0x115   : > { %3287 = vrsqrt.f32 %v1191_v19  ;;  %v1154_v55 = vrot.slane %v1153_v21, 1  ;;  %vm1199_vm11 = vweird.f32 %v1191_v19 }
 0x117   : > { %v1155_v23 = vadd.f32 %v1154_v55, %v1153_v21  ;;  %v1334_v21 = vld [vmem:[%s4668_s3 + $0x58] sm:$0xff]  ;;  %v3030_v55 = vld [vmem:[%s4668_s3 + $0x150] sm:$0xff] }
 0x119   : > { %v1164_v24 = vmul.f32 %v3651_v38, %v1155_v23  ;;  %v1354_v23 = vld [vmem:[%s4668_s3 + $0xf8] sm:$0xff] }
 0x11b   : > { %v3288_v60 = vpop.eup %3287  ;;  %v1166_v3 = vsub.f32 %v1137_v63, %v1164_v24  ;;  %v1168_v25 = vsub.f32 %v1139_v61, %v1164_v24  ;;  %v1338_v61 = vld [vmem:[%s4668_s3 + $0x78] sm:$0xff]  ;;  %v1337_v63 = vld [vmem:[%s4668_s3 + $0x70] sm:$0xff] }
 0x11c   : > { %v1194_v26 = vmul.f32 %v3288_v60, %v1191_v19  ;;  %vm1200_vm10 = vweird.f32 %v3288_v60  ;;  %v3031_v19 = vld [vmem:[%s4668_s3 + $0x158] sm:$0xff]  ;;  %v1333_v24 = vld [vmem:[%s4668_s3 + $0x50] sm:$0xff] }
 0x11d   : > { %v1170_v28 = vmul.f32 %v1166_v3, %v1166_v3  ;;  %v1172_v16 = vmul.f32 %v1168_v25, %v1168_v25  ;;  %vm1201_vm12 = vmor %vm1199_vm11, %vm1200_vm10  ;;  %1420 = vmatpush.msra.mxu2 %v3031_v19  ;;  %v3092_v19 = vld [vmem:[%s4668_s3 + $0x340] sm:$0xff] }
 0x11e   : > { %v1195_v30 = vmul.f32 %v3288_v60, %v1194_v26  ;;  %v1332_v26 = vld [vmem:[%s4668_s3 + $0x48] sm:$0xff] }
 0x11f   : > { %v1181_v2 = vsel %vm602_vm5, %v1172_v16, 0.0  ;;  %1421 = vmatpush.msra.mxu2 %v3030_v55  ;;  %v1351_v16 = vld [vmem:[%s4668_s3 + $0xe0] sm:$0xff] }
 0x120   : > { %v1196_v10 = vmul.f32 0.5, %v1195_v30  ;;  %v1182_v31 = vadd.f32 %v1181_v2, %v1170_v28  ;;  %v3028_v28 = vld [vmem:[%s4668_s3 + $0x140] sm:$0xff]  ;;  %v3027_v30 = vld [vmem:[%s4668_s3 + $0x138] sm:$0xff] }
 0x121   : > { %v1330_v2 = vld [vmem:[%s4668_s3 + $0x38] sm:$0xff]  ;;  %v3044_v55 = vld [vmem:[%s4668_s3 + $0x1c0] sm:$0xff] }
 0x122   : > { %v1197_v32 = vsub.f32 1.5, %v1196_v10  ;;  %v1183_v8 = vrot.slane %v1182_v31, 4  ;;  %v3026_v10 = vld [vmem:[%s4668_s3 + $0x130] sm:$0xff] }
 0x124   : > { %v1198_v34 = vmul.f32 %v3288_v60, %v1197_v32  ;;  %v1184_v36 = vadd.f32 %v1183_v8, %v1182_v31  ;;  %v1329_v31 = vld [vmem:[%s4668_s3 + $0x30] sm:$0xff]  ;;  %v1328_v32 = vld [vmem:[%s4668_s3 + $0x28] sm:$0xff]  ;;  %v3024_v8 = vld [vmem:[%s4668_s3 + $0x120] sm:$0xff] }
 0x126   : > { %v1202_v27 = vsel %vm1201_vm12, %v3288_v60, %v1198_v34  ;;  %v1185_v14 = vrot.slane %v1184_v36, 2  ;;  %v1353_v60 = vld [vmem:[%s4668_s3 + $0xf0] sm:$0xff]  ;;  %v1327_v34 = vld [vmem:[%s4668_s3 + $0x20] sm:$0xff] }
 0x127   : > { %v1215_v39 = vmul.f32 %v1202_v27, %v1167_v45  ;;  %v1213_v40 = vmul.f32 %v1202_v27, %v1165_v42  ;;  %v1326_v27 = vld [vmem:[%s4668_s3 + $0x18] sm:$0xff] }
 0x128   : > { %v1186_v1 = vadd.f32 %v1185_v14, %v1184_v36  ;;  %v3023_v36 = vld [vmem:[%s4668_s3 + $0x118] sm:$0xff]  ;;  %v1325_v14 = vld [vmem:[%s4668_s3 + $0x10] sm:$0xff] }
 0x129   : > { %vm1219_vm13 = vcmp.ge.f32.partialorder %v1215_v39, 0.0  ;;  %v1223_v35 = vmul.f32 0.2, %v1215_v39  ;;  %v1221_v41 = vmul.f32 0.2, %v1213_v40  ;;  %vm1217_vm15 = vcmp.ge.f32.partialorder %v1213_v40, 0.0 }
 0x12a   : > { %v1187_v18 = vrot.slane %v1186_v1, 1 }
 0x12b   : > { %v1227_v43 = vsel %vm1219_vm13, %v1215_v39, %v1223_v35  ;;  %v1225_v22 = vsel %vm1217_vm15, %v1213_v40, %v1221_v41  ;;  %v1324_v39 = vld [vmem:[%s4668_s3 + $0x8] sm:$0xff]  ;;  %v3022_v40 = vld [vmem:[%s4668_s3 + $0x110] sm:$0xff]  ;;  %v1323_v41 = vld [vmem:[%s4668_s3] sm:$0xff] }
 0x12c   : > { %v1188_v46 = vadd.f32 %v1187_v18, %v1186_v1  ;;  %3010 = vmatpush.msk.msrb.mxu0 %vm602_vm5, %v1227_v43  ;;  %v1350_v1 = vld [vmem:[%s4668_s3 + $0xd8] sm:$0xff]  ;;  %v3021_v35 = vld [vmem:[%s4668_s3 + $0x108] sm:$0xff]  ;;  %v1349_v18 = vld [vmem:[%s4668_s3 + $0xd0] sm:$0xff] }
 0x12d   : > { %v3099_v43 = vld [vmem:[%s4668_s3 + $0x378] sm:$0xff] }
 0x12e   : > { %v1190_v42 = vmul.f32 %v1188_v46, %v3651_v38  ;;  %1280 = vmatpush.msrb.mxu0 %v1225_v22  ;;  %v3020_v46 = vld [vmem:[%s4668_s3 + $0x100] sm:$0xff]  ;;  %v3051_v22 = vld [vmem:[%s4668_s3 + $0x1f8] sm:$0xff] }
 0x12f   : > { %3011 = vmatmul.msk.f32.vlgmr.msrb.gmra.mxu0 %vm1246_vm1, %v3667_v47  ;;  %1442 = vmatpush.msra.mxu3 %v3051_v22  ;;  %v3111_v22 = vld [vmem:[%s4668_s3 + $0x3d8] sm:$0xff] }
 0x130   : > { %v1192_v45 = vadd.f32 1e-05, %v1190_v42  ;;  %1468 = vmatpush.msra.mxu0 %v1338_v61  ;;  %v1348_v42 = vld [vmem:[%s4668_s3 + $0xc8] sm:$0xff]  ;;  %v3064_v61 = vld [vmem:[%s4668_s3 + $0x260] sm:$0xff] }
 0x132   : > { %3289 = vrsqrt.f32 %v1192_v45  ;;  %vm1209_vm8 = vweird.f32 %v1192_v45  ;;  %1469 = vmatpush.msra.mxu0 %v1337_v63  ;;  %v3047_v63 = vld [vmem:[%s4668_s3 + $0x1d8] sm:$0xff] }
 0x134   : > { %1470 = vmatpush.msra.mxu0 %v1336_v11  ;;  %v1343_v11 = vld [vmem:[%s4668_s3 + $0xa0] sm:$0xff] }
 0x136   : > { %1471 = vmatpush.msra.mxu0 %v1335_v15  ;;  %v3045_v15 = vld [vmem:[%s4668_s3 + $0x1c8] sm:$0xff] }
 0x137   : > { %3012 = vmatmul.msk.f32.gmra.mxu0 %vm1246_vm1, %v3675_v48 }
 0x138   : > { %v3290_v50 = vpop.eup %3289  ;;  %1472 = vmatpush.msra.mxu0 %v1334_v21  ;;  %v3061_v21 = vld [vmem:[%s4668_s3 + $0x248] sm:$0xff] }
 0x139   : > { %v1204_v33 = vmul.f32 %v3290_v50, %v1192_v45  ;;  %vm1210_vm7 = vweird.f32 %v3290_v50  ;;  %v3067_v45 = vld [vmem:[%s4668_s3 + $0x278] sm:$0xff] }
 0x13a   : > { %vm1211_vm10 = vmor %vm1209_vm8, %vm1210_vm7  ;;  %1473 = vmatpush.msra.mxu0 %v1333_v24  ;;  %v3060_v24 = vld [vmem:[%s4668_s3 + $0x240] sm:$0xff]  ;;  %vm1809_vm7 = vcmask 195584  }
 0x13b   : > { %v1205_v38 = vmul.f32 %v3290_v50, %v1204_v33  ;;  %v1347_v33 = vld [vmem:[%s4668_s3 + $0xc0] sm:$0xff] }
 0x13c   : > { %1474 = vmatpush.msra.mxu0 %v1332_v26  ;;  %v3090_v26 = vld [vmem:[%s4668_s3 + $0x330] sm:$0xff] }
 0x13d   : > { %v1206_v52 = vmul.f32 0.5, %v1205_v38  ;;  %v3066_v38 = vld [vmem:[%s4668_s3 + $0x270] sm:$0xff] }
 0x13e   : > { %1475 = vmatpush.msra.mxu0 %v1331_v29  ;;  %v1339_v29 = vld [vmem:[%s4668_s3 + $0x80] sm:$0xff] }
 0x13f   : > { %v1207_v53 = vsub.f32 1.5, %v1206_v52  ;;  %3013 = vmatmul.msk.f32.gmra.mxu0 %vm1246_vm1, %v3682_v51  ;;  %v3097_v52 = vld [vmem:[%s4668_s3 + $0x368] sm:$0xff] }
 0x140   : > { %1476 = vmatpush.msra.mxu0 %v1330_v2  ;;  %v3089_v2 = vld [vmem:[%s4668_s3 + $0x328] sm:$0xff] }
 0x141   : > { %v1208_v54 = vmul.f32 %v3290_v50, %v1207_v53  ;;  %v1346_v53 = vld [vmem:[%s4668_s3 + $0xb8] sm:$0xff] }
 0x142   : > { %1477 = vmatpush.msra.mxu0 %v1329_v31  ;;  %v3115_v31 = vld [vmem:[%s4668_s3 + $0x3f8] sm:$0xff] }
 0x143   : > { %v1212_v57 = vsel %vm1211_vm10, %v3290_v50, %v1208_v54  ;;  %v3050_v50 = vld [vmem:[%s4668_s3 + $0x1f0] sm:$0xff]  ;;  %v3096_v54 = vld [vmem:[%s4668_s3 + $0x360] sm:$0xff] }
 0x144   : > { %v1216_v44 = vmul.f32 %v1212_v57, %v1168_v25  ;;  %v1214_v59 = vmul.f32 %v1212_v57, %v1166_v3  ;;  %v3029_v3 = vld [vmem:[%s4668_s3 + $0x148] sm:$0xff]  ;;  %1478 = vmatpush.msra.mxu0 %v1328_v32  ;;  %1443 = vmatpush.msra.mxu3 %v3050_v50 }
 0x145   : > { %v1352_v25 = vld [vmem:[%s4668_s3 + $0xe8] sm:$0xff]  ;;  %1422 = vmatpush.msra.mxu2 %v3029_v3  ;;  %v3043_v3 = vld [vmem:[%s4668_s3 + $0x1b8] sm:$0xff] }
 0x146   : > { %vm1220_vm11 = vcmp.ge.f32.partialorder %v1216_v44, 0.0  ;;  %v1224_v0 = vmul.f32 0.2, %v1216_v44  ;;  %v1222_v6 = vmul.f32 0.2, %v1214_v59  ;;  %vm1218_vm12 = vcmp.ge.f32.partialorder %v1214_v59, 0.0  ;;  %1479 = vmatpush.msra.mxu0 %v1327_v34  ;;  %1444 = vmatpush.msra.mxu3 %v3049_v9 }
 0x147   : > { %3014 = vmatmul.msk.f32.gmra.mxu0 %vm1246_vm1, %v3689_v58  ;;  %1423 = vmatpush.msra.mxu2 %v3028_v28  ;;  %v3065_v57 = vld [vmem:[%s4668_s3 + $0x268] sm:$0xff]  ;;  %v3059_v28 = vld [vmem:[%s4668_s3 + $0x238] sm:$0xff]  ;;  %v3114_v34 = vld [vmem:[%s4668_s3 + $0x3f0] sm:$0xff] }
 0x148   : > { %v1228_v12 = vsel %vm1220_vm11, %v1216_v44, %v1224_v0  ;;  %v1226_v17 = vsel %vm1218_vm12, %v1214_v59, %v1222_v6  ;;  %1480 = vmatpush.msra.mxu0 %v1326_v27  ;;  %v3048_v44 = vld [vmem:[%s4668_s3 + $0x1e0] sm:$0xff]  ;;  %v1345_v59 = vld [vmem:[%s4668_s3 + $0xb0] sm:$0xff]  ;;  %v3063_v6 = vld [vmem:[%s4668_s3 + $0x258] sm:$0xff]  ;;  %vm2158_vm11 = vcmask 523264  }
 0x149   : > { %3015 = vmatpush.msk.msra.mxu1 %vm602_vm5, %v1228_v12  ;;  %1424 = vmatpush.msra.mxu2 %v3027_v30  ;;  %v3094_v0 = vld [vmem:[%s4668_s3 + $0x350] sm:$0xff]  ;;  %v3057_v32 = vld [vmem:[%s4668_s3 + $0x228] sm:$0xff]  ;;  %v3087_v27 = vld [vmem:[%s4668_s3 + $0x318] sm:$0xff] }
 0x14a   : > { %1481 = vmatpush.msra.mxu0 %v1325_v14  ;;  %1445 = vmatpush.msra.mxu3 %v3048_v44  ;;  %v3062_v12 = vld [vmem:[%s4668_s3 + $0x250] sm:$0xff]  ;;  %v3039_v14 = vld [vmem:[%s4668_s3 + $0x198] sm:$0xff]  ;;  %v3109_v9 = vld [vmem:[%s4668_s3 + $0x3c8] sm:$0xff] }
 0x14b   : > { %1309 = vmatpush.msra.mxu1 %v1226_v17  ;;  %1425 = vmatpush.msra.mxu2 %v3026_v10  ;;  %v1342_v17 = vld [vmem:[%s4668_s3 + $0x98] sm:$0xff]  ;;  %v3058_v30 = vld [vmem:[%s4668_s3 + $0x230] sm:$0xff]  ;;  %v3041_v10 = vld [vmem:[%s4668_s3 + $0x1a8] sm:$0xff] }
 0x14c   : > { %3016 = vmatmul.msk.f32.vlgmr.msra.gmra.mxu1 %vm1246_vm1, %v3667_v47  ;;  %1482 = vmatpush.msra.mxu0 %v1324_v39  ;;  %v3113_v39 = vld [vmem:[%s4668_s3 + $0x3e8] sm:$0xff]  ;;  %v3107_v44 = vld [vmem:[%s4668_s3 + $0x3b8] sm:$0xff] }
 0x14d   : > { %1494 = vmatpush.msrb.mxu1 %v1354_v23  ;;  %1426 = vmatpush.msra.mxu2 %v3025_v20  ;;  %v1341_v23 = vld [vmem:[%s4668_s3 + $0x90] sm:$0xff]  ;;  %v3088_v20 = vld [vmem:[%s4668_s3 + $0x320] sm:$0xff] }
 0x14e   : > { %1483 = vmatpush.msra.mxu0 %v1323_v41  ;;  %1446 = vmatpush.msra.mxu3 %v3047_v63  ;;  %v3112_v41 = vld [vmem:[%s4668_s3 + $0x3e0] sm:$0xff]  ;;  %v3106_v63 = vld [vmem:[%s4668_s3 + $0x3b0] sm:$0xff] }
 0x14f   : > { %1495 = vmatpush.msrb.mxu1 %v1353_v60  ;;  %1427 = vmatpush.msra.mxu2 %v3024_v8  ;;  %v3091_v60 = vld [vmem:[%s4668_s3 + $0x338] sm:$0xff]  ;;  %v3040_v8 = vld [vmem:[%s4668_s3 + $0x1a0] sm:$0xff] }
 0x150   : > { %1681 = vmatpush.msrb.mxu0 %v3099_v43  ;;  %1447 = vmatpush.msra.mxu3 %v3046_v7  ;;  %v3054_v43 = vld [vmem:[%s4668_s3 + $0x210] sm:$0xff] }
 0x151   : > { %1496 = vmatpush.msrb.mxu1 %v1352_v25  ;;  %1428 = vmatpush.msra.mxu2 %v3023_v36  ;;  %v1340_v25 = vld [vmem:[%s4668_s3 + $0x88] sm:$0xff]  ;;  %v3056_v36 = vld [vmem:[%s4668_s3 + $0x220] sm:$0xff] }
 0x152   : > { %1682 = vmatpush.msrb.mxu0 %v3098_v49  ;;  %1448 = vmatpush.msra.mxu3 %v3045_v15  ;;  %v3036_v49 = vld [vmem:[%s4668_s3 + $0x180] sm:$0xff]  ;;  %v3103_v15 = vld [vmem:[%s4668_s3 + $0x398] sm:$0xff] }
 0x153   : > { %1497 = vmatpush.msrb.mxu1 %v1351_v16  ;;  %1429 = vmatpush.msra.mxu2 %v3022_v40  ;;  %v3042_v16 = vld [vmem:[%s4668_s3 + $0x1b0] sm:$0xff] }
 0x154   : > { %3017 = vmatmul.msk.f32.gmra.mxu1 %vm1246_vm1, %v3675_v48  ;;  %1683 = vmatpush.msrb.mxu0 %v3097_v52  ;;  %v3086_v40 = vld [vmem:[%s4668_s3 + $0x310] sm:$0xff]  ;;  %v3083_v52 = vld [vmem:[%s4668_s3 + $0x2f8] sm:$0xff] }
 0x155   : > { %1498 = vmatpush.msrb.mxu1 %v1350_v1  ;;  %1430 = vmatpush.msra.mxu2 %v3021_v35  ;;  %v3055_v1 = vld [vmem:[%s4668_s3 + $0x218] sm:$0xff]  ;;  %v3038_v35 = vld [vmem:[%s4668_s3 + $0x190] sm:$0xff] }
 0x156   : > { %1684 = vmatpush.msrb.mxu0 %v3096_v54  ;;  %1449 = vmatpush.msra.mxu3 %v3044_v55  ;;  %v3108_v54 = vld [vmem:[%s4668_s3 + $0x3c0] sm:$0xff] }
 0x157   : > { %1499 = vmatpush.msrb.mxu1 %v1349_v18  ;;  %1431 = vmatpush.msra.mxu2 %v3020_v46  ;;  %v3085_v18 = vld [vmem:[%s4668_s3 + $0x308] sm:$0xff] }
 0x158   : > { %1685 = vmatpush.msrb.mxu0 %v3095_v62  ;;  %1450 = vmatpush.msra.mxu3 %v3043_v3  ;;  %v3037_v46 = vld [vmem:[%s4668_s3 + $0x188] sm:$0xff] }
 0x159   : > { %1500 = vmatpush.msrb.mxu1 %v1348_v42  ;;  %1573 = vmatpush.msrb.mxu2 %v3067_v45  ;;  %v3053_v42 = vld [vmem:[%s4668_s3 + $0x208] sm:$0xff]  ;;  %v3084_v45 = vld [vmem:[%s4668_s3 + $0x300] sm:$0xff] }
 0x15a   : > { %1686 = vmatpush.msrb.mxu0 %v3094_v0  ;;  %1451 = vmatpush.msra.mxu3 %v3042_v16  ;;  %v3079_v0 = vld [vmem:[%s4668_s3 + $0x2d8] sm:$0xff]  ;;  %v3101_v3 = vld [vmem:[%s4668_s3 + $0x388] sm:$0xff] }
 0x15b   : > { %1501 = vmatpush.msrb.mxu1 %v1347_v33  ;;  %1574 = vmatpush.msrb.mxu2 %v3066_v38  ;;  %v3110_v33 = vld [vmem:[%s4668_s3 + $0x3d0] sm:$0xff]  ;;  %v3052_v38 = vld [vmem:[%s4668_s3 + $0x200] sm:$0xff]  ;;  %v3073_v16 = vld [vmem:[%s4668_s3 + $0x2a8] sm:$0xff] }
 0x15c   : > { %3018 = vmatmul.msk.f32.gmra.mxu1 %vm1246_vm1, %v3682_v51  ;;  %1687 = vmatpush.msrb.mxu0 %v3093_v13  ;;  %v3077_v13 = vld [vmem:[%s4668_s3 + $0x2c8] sm:$0xff] }
 0x15d   : > { %1502 = vmatpush.msrb.mxu1 %v1346_v53  ;;  %1575 = vmatpush.msrb.mxu2 %v3065_v57  ;;  %v3082_v53 = vld [vmem:[%s4668_s3 + $0x2f0] sm:$0xff]  ;;  %v3081_v57 = vld [vmem:[%s4668_s3 + $0x2e8] sm:$0xff] }
 0x15e   : > { %1688 = vmatpush.msrb.mxu0 %v3092_v19  ;;  %1452 = vmatpush.msra.mxu3 %v3041_v10 }
 0x15f   : > { %1503 = vmatpush.msrb.mxu1 %v1345_v59  ;;  %1576 = vmatpush.msrb.mxu2 %v3064_v61  ;;  %v3080_v61 = vld [vmem:[%s4668_s3 + $0x2e0] sm:$0xff] }
 0x160   : > { %1689 = vmatpush.msrb.mxu0 %v3091_v60  ;;  %1453 = vmatpush.msra.mxu3 %v3040_v8  ;;  %v3070_v8 = vld [vmem:[%s4668_s3 + $0x290] sm:$0xff] }
 0x161   : > { %1504 = vmatpush.msrb.mxu1 %v1344_v56  ;;  %1577 = vmatpush.msrb.mxu2 %v3063_v6  ;;  %v3105_v6 = vld [vmem:[%s4668_s3 + $0x3a8] sm:$0xff] }
 0x162   : > { %1690 = vmatpush.msrb.mxu0 %v3090_v26  ;;  %1454 = vmatpush.msra.mxu3 %v3039_v14  ;;  %v3074_v26 = vld [vmem:[%s4668_s3 + $0x2b0] sm:$0xff] }
 0x163   : > { %1505 = vmatpush.msrb.mxu1 %v1343_v11  ;;  %1578 = vmatpush.msrb.mxu2 %v3062_v12  ;;  %v3078_v11 = vld [vmem:[%s4668_s3 + $0x2d0] sm:$0xff]  ;;  %v3104_v12 = vld [vmem:[%s4668_s3 + $0x3a0] sm:$0xff] }
 0x164   : > { %3019 = vmatmul.msk.f32.gmra.mxu1 %vm1246_vm1, %v3689_v58  ;;  %1691 = vmatpush.msrb.mxu0 %v3089_v2 }
 0x165   : > { %1506 = vmatpush.msrb.mxu1 %v1342_v17  ;;  %1579 = vmatpush.msrb.mxu2 %v3061_v21  ;;  %v3076_v17 = vld [vmem:[%s4668_s3 + $0x2c0] sm:$0xff]  ;;  %v3102_v21 = vld [vmem:[%s4668_s3 + $0x390] sm:$0xff] }
 0x166   : > { %1692 = vmatpush.msrb.mxu0 %v3088_v20  ;;  %1455 = vmatpush.msra.mxu3 %v3038_v35 }
 0x167   : > { %1507 = vmatpush.msrb.mxu1 %v1341_v23  ;;  %1580 = vmatpush.msrb.mxu2 %v3060_v24  ;;  %v3075_v23 = vld [vmem:[%s4668_s3 + $0x2b8] sm:$0xff] }
 0x168   : > { %1693 = vmatpush.msrb.mxu0 %v3087_v27  ;;  %1456 = vmatpush.msra.mxu3 %v3037_v46 }
 0x169   : > { %1508 = vmatpush.msrb.mxu1 %v1340_v25  ;;  %1581 = vmatpush.msrb.mxu2 %v3059_v28  ;;  %v3100_v28 = vld [vmem:[%s4668_s3 + $0x380] sm:$0xff] }
 0x16a   : > { %1694 = vmatpush.msrb.mxu0 %v3086_v40  ;;  %1457 = vmatpush.msra.mxu3 %v3036_v49  ;;  %v3068_v40 = vld [vmem:[%s4668_s3 + $0x280] sm:$0xff] }
 0x16b   : > { %1509 = vmatpush.msrb.mxu1 %v1339_v29  ;;  %1582 = vmatpush.msrb.mxu2 %v3058_v30  ;;  %v3072_v30 = vld [vmem:[%s4668_s3 + $0x2a0] sm:$0xff] }
 0x16c   : > { %1695 = vmatpush.msrb.mxu0 %v3085_v18  ;;  %1599 = vmatpush.msrb.mxu3 %v3083_v52 }
 0x16d   : > { %1707 = vmatpush.msra.mxu1 %v3115_v31  ;;  %1583 = vmatpush.msrb.mxu2 %v3057_v32  ;;  %v3071_v31 = vld [vmem:[%s4668_s3 + $0x298] sm:$0xff] }
 0x16e   : > { %1696 = vmatpush.msrb.mxu0 %v3084_v45  ;;  %1600 = vmatpush.msrb.mxu3 %v3082_v53 }
 0x16f   : > { %1708 = vmatpush.msra.mxu1 %v3114_v34  ;;  %1584 = vmatpush.msrb.mxu2 %v3056_v36  ;;  %v3069_v36 = vld [vmem:[%s4668_s3 + $0x288] sm:$0xff] }
 0x170   : > { %1601 = vmatpush.msrb.mxu3 %v3081_v57 }
 0x171   : > { %1709 = vmatpush.msra.mxu1 %v3113_v39  ;;  %1585 = vmatpush.msrb.mxu2 %v3055_v1 }
 0x172   : > { %1602 = vmatpush.msrb.mxu3 %v3080_v61 }
 0x173   : > { %1710 = vmatpush.msra.mxu1 %v3112_v41  ;;  %1586 = vmatpush.msrb.mxu2 %v3054_v43 }
 0x174   : > { %1603 = vmatpush.msrb.mxu3 %v3079_v0 }
 0x175   : > { %1711 = vmatpush.msra.mxu1 %v3111_v22  ;;  %1587 = vmatpush.msrb.mxu2 %v3053_v42 }
 0x176   : > { %1604 = vmatpush.msrb.mxu3 %v3078_v11 }
 0x177   : > { %1712 = vmatpush.msra.mxu1 %v3110_v33  ;;  %1588 = vmatpush.msrb.mxu2 %v3052_v38 }
 0x178   : > { %1605 = vmatpush.msrb.mxu3 %v3077_v13 }
 0x179   : > { %1713 = vmatpush.msra.mxu1 %v3109_v9 }
 0x17a   : > { %1606 = vmatpush.msrb.mxu3 %v3076_v17 }
 0x17b   : > { %1714 = vmatpush.msra.mxu1 %v3108_v54 }
 0x17c   : > { %1607 = vmatpush.msrb.mxu3 %v3075_v23 }
 0x17d   : > { %1715 = vmatpush.msra.mxu1 %v3107_v44 }
 0x17e   : > { %1608 = vmatpush.msrb.mxu3 %v3074_v26 }
 0x17f   : > { %1716 = vmatpush.msra.mxu1 %v3106_v63 }
 0x180   : > { %1609 = vmatpush.msrb.mxu3 %v3073_v16 }
 0x181   : > { %1717 = vmatpush.msra.mxu1 %v3105_v6 }
 0x182   : > { %1610 = vmatpush.msrb.mxu3 %v3072_v30 }
 0x183   : > { %1718 = vmatpush.msra.mxu1 %v3104_v12 }
 0x184   : > { %1611 = vmatpush.msrb.mxu3 %v3071_v31 }
 0x185   : > { %1719 = vmatpush.msra.mxu1 %v3103_v15 }
 0x186   : > { %1612 = vmatpush.msrb.mxu3 %v3070_v8 }
 0x187   : > { %1720 = vmatpush.msra.mxu1 %v3102_v21 }
 0x188   : > { %1613 = vmatpush.msrb.mxu3 %v3069_v36 }
 0x189   : > { %1721 = vmatpush.msra.mxu1 %v3101_v3 }
 0x18a   : > { %1614 = vmatpush.msrb.mxu3 %v3068_v40 }
 0x18b   : > { %1722 = vmatpush.msra.mxu1 %v3100_v28 }
 0x1ac   : > { %v4002_v50 = vpop.f32.mrf.mxu0 }
 0x1ad   : > { %1484 = vmatmul.f32.vlgmr.msra.gmra.mxu0 %v4002_v50  ;;  %v1396_v59 = vrot.slane %v4002_v50, 1  ;;  %v1661_v24 = vrot.slane %v4002_v50, 3  ;;  %v1553_v14 = vrot.slane %v4002_v50, 2 }
 0x1b4   : > { %v4033_v62 = vpop.f32.mrf.mxu0 }
 0x1b5   : > { %v1397_v56 = vrot.slane %v4033_v62, 1  ;;  %1487 = vmatmul.f32.gmra.mxu0 %v4033_v62  ;;  %v1662_v60 = vrot.slane %v4033_v62, 3  ;;  %v1554_v39 = vrot.slane %v4033_v62, 2 }
 0x1b7   : > { %v1398_v7 = vsel %vm348_vm3, %v1396_v59, %v1397_v56  ;;  %v1663_v29 = vsel %vm357_vm0, %v1661_v24, %v1662_v60  ;;  %v1555_v35 = vsel %vm469_vm4, %v1553_v14, %v1554_v39 }
 0x1b8   : > { %1432 = vmatmul.f32.vlgmr.msra.gmra.mxu2 %v1398_v7 }
 0x1bc   : > { %v4062_v19 = vpop.f32.mrf.mxu0 }
 0x1bd   : > { %v1402_v55 = vrot.slane %v4062_v19, 1  ;;  %1490 = vmatmul.f32.gmra.mxu0 %v4062_v19  ;;  %v1667_v20 = vrot.slane %v4062_v19, 3  ;;  %v1559_v22 = vrot.slane %v4062_v19, 2 }
 0x1bf   : > { %v1403_v25 = vsel %vm348_vm3, %v1397_v56, %v1402_v55  ;;  %v1668_v27 = vsel %vm357_vm0, %v1662_v60, %v1667_v20  ;;  %v1560_v45 = vsel %vm469_vm4, %v1554_v39, %v1559_v22 }
 0x1c0   : > { %1435 = vmatmul.f32.gmra.mxu2 %v1403_v25 }
 0x1c4   : > { %v1291_v2 = vpop.f32.mrf.mxu0 }
 0x1c5   : > { %v1406_v10 = vrot.slane %v1291_v2, 1  ;;  %1697 = vmatmul.f32.vlgmr.msrb.gmra.mxu0 %v1663_v29  ;;  %v1671_v1 = vrot.slane %v1291_v2, 3  ;;  %v1563_v33 = vrot.slane %v1291_v2, 2 }
 0x1c7   : > { %v1407_v32 = vsel %vm348_vm3, %v1402_v55, %v1406_v10  ;;  %v1672_v46 = vsel %vm357_vm0, %v1667_v20, %v1671_v1  ;;  %v1564_v9 = vsel %vm469_vm4, %v1559_v22, %v1563_v33 }
 0x1c8   : > { %1438 = vmatmul.f32.gmra.mxu2 %v1407_v32 }
 0x1c9   : > { %v1311_v34 = vpop.f32.mrf.mxu1 }
 0x1ca   : > { %1510 = vmatmul.f32.vlgmr.msrb.gmra.mxu1 %v1311_v34  ;;  %v1399_v18 = vrot.slane %v1311_v34, 1  ;;  %v1664_v53 = vrot.slane %v1311_v34, 3  ;;  %v1556_v56 = vrot.slane %v1311_v34, 2 }
 0x1cd   : > { %1700 = vmatmul.f32.gmra.mxu0 %v1668_v27 }
 0x1d0   : > { %1589 = vmatmul.f32.vlgmr.msrb.gmra.mxu2 %v1555_v35 }
 0x1d1   : > { %v1314_v41 = vpop.f32.mrf.mxu1 }
 0x1d2   : > { %1513 = vmatmul.f32.gmra.mxu1 %v1314_v41  ;;  %v1400_v43 = vrot.slane %v1314_v41, 1  ;;  %v1665_v52 = vrot.slane %v1314_v41, 3  ;;  %v1557_v62 = vrot.slane %v1314_v41, 2 }
 0x1d4   : > { %v1401_v42 = vsel %vm348_vm3, %v1399_v18, %v1400_v43  ;;  %v1666_v57 = vsel %vm357_vm0, %v1664_v53, %v1665_v52  ;;  %v1558_v0 = vsel %vm469_vm4, %v1556_v56, %v1557_v62  ;;  %v3282_v53 = vld [vmem:[%s4669_s4] ss:$0 sm:$0xff] }
 0x1d5   : > { %1458 = vmatmul.f32.vlgmr.msra.gmra.mxu3 %v1401_v42  ;;  %1703 = vmatmul.f32.gmra.mxu0 %v1672_v46 }
 0x1d8   : > { %1592 = vmatmul.f32.gmra.mxu2 %v1560_v45 }
 0x1d9   : > { %v1317_v49 = vpop.f32.mrf.mxu1 }
 0x1da   : > { %1516 = vmatmul.f32.gmra.mxu1 %v1317_v49  ;;  %v1404_v50 = vrot.slane %v1317_v49, 1  ;;  %v1669_v61 = vrot.slane %v1317_v49, 3  ;;  %v1561_v7 = vrot.slane %v1317_v49, 2 }
 0x1dc   : > { %v1405_v38 = vsel %vm348_vm3, %v1400_v43, %v1404_v50  ;;  %v1670_v63 = vsel %vm357_vm0, %v1665_v52, %v1669_v61  ;;  %v1562_v12 = vsel %vm469_vm4, %v1557_v62, %v1561_v7  ;;  %v3333_v43 = vmov 24.0  }
 0x1dd   : > { %1461 = vmatmul.f32.gmra.mxu3 %v1405_v38  ;;  %3291 = vrcp.f32 %v3333_v43 }
 0x1e0   : > { %1595 = vmatmul.f32.gmra.mxu2 %v1564_v9 }
 0x1e1   : > { %v1320_v54 = vpop.f32.mrf.mxu1 }
 0x1e2   : > { %1723 = vmatmul.f32.vlgmr.msra.gmra.mxu1 %v1666_v57  ;;  %v1408_v44 = vrot.slane %v1320_v54, 1  ;;  %v1673_v6 = vrot.slane %v1320_v54, 3  ;;  %v1565_v13 = vrot.slane %v1320_v54, 2 }
 0x1e3   : > { %v3292_v52 = vpop.eup %3291 }
 0x1e4   : > { %v1409_v59 = vsel %vm348_vm3, %v1404_v50, %v1408_v44  ;;  %v1674_v11 = vsel %vm357_vm0, %v1669_v61, %v1673_v6  ;;  %v1566_v15 = vsel %vm469_vm4, %v1561_v7, %v1565_v13  ;;  %vm1756_vm5 = vweird.f32 %v3292_v52 }
 0x1e5   : > { %1464 = vmatmul.f32.gmra.mxu3 %v1409_v59 }
 0x1ea   : > { %1726 = vmatmul.f32.gmra.mxu1 %v1670_v63  ;;  %v1752_v63 = vmul.f32 24.0, %v3292_v52 }
 0x1ed   : > { %1615 = vmatmul.f32.vlgmr.msrb.gmra.mxu3 %v1558_v0 }
 0x1f2   : > { %1729 = vmatmul.f32.gmra.mxu1 %v1674_v11  ;;  %v1753_v11 = vsub.f32 1.0, %v1752_v63  ;;  %v3171_v63 = vld [vmem:[%s4670_s5 + $0x1e8] sm:$0xff] }
 0x1f5   : > { %1618 = vmatmul.f32.gmra.mxu3 %v1562_v12 }
 0x1fd   : > { %1621 = vmatmul.f32.gmra.mxu3 %v1566_v15  ;;  %v1754_v15 = vmul.f32 %v3292_v52, %v1753_v11  ;;  %v3137_v11 = vld [vmem:[%s4670_s5 + $0xd8] sm:$0xff] }
 0x22a   : > { %v1485_v21 = vpop.f32.mrf.mxu0 }
 0x232   : > { %v1488_v60 = vpop.f32.mrf.mxu0 }
 0x23a   : > { %v1491_v28 = vpop.f32.mrf.mxu0 }
 0x23b   : > { %v1433_v17 = vpop.f32.mrf.mxu2 }
 0x242   : > { %v1698_v2 = vpop.f32.mrf.mxu0 }
 0x243   : > { %v1436_v55 = vpop.f32.mrf.mxu2 }
 0x247   : > { %v1511_v19 = vpop.f32.mrf.mxu1 }
 0x24a   : > { %v1701_v27 = vpop.f32.mrf.mxu0 }
 0x24b   : > { %v1439_v25 = vpop.f32.mrf.mxu2 }
 0x24f   : > { %v1514_v23 = vpop.f32.mrf.mxu1 }
 0x252   : > { %v1704_v44 = vpop.f32.mrf.mxu0 }
 0x253   : > { %v1590_v29 = vpop.f32.mrf.mxu2 }
 0x257   : > { %v1517_v26 = vpop.f32.mrf.mxu1 }
 0x258   : > { %v1459_v24 = vpop.f32.mrf.mxu3 }
 0x259   : > { %v1460_v20 = vadd.f32 %v1459_v24, %v1433_v17 }
 0x25b   : > { %v1593_v32 = vpop.f32.mrf.mxu2  ;;  %v1486_v36 = vadd.f32 %v1485_v21, %v1460_v20  ;;  %v1755_v21 = vadd.f32 %v3292_v52, %v1754_v15  ;;  %v3136_v15 = vld [vmem:[%s4670_s5 + $0xd0] sm:$0xff] }
 0x25d   : > { %v1512_v41 = vadd.f32 %v1511_v19, %v1486_v36  ;;  %v1757_v24 = vsel %vm1756_vm5, %v3292_v52, %v1755_v21  ;;  %v3135_v21 = vld [vmem:[%s4670_s5 + $0xc8] sm:$0xff] }
 0x25f   : > { %v1724_v30 = vpop.f32.mrf.mxu1 }
 0x260   : > { %v1462_v3 = vpop.f32.mrf.mxu3  ;;  %v1725_v45 = vadd.f32 %v1724_v30, %v1698_v2 }
 0x261   : > { %v1463_v31 = vadd.f32 %v1462_v3, %v1436_v55 }
 0x263   : > { %v1489_v8 = vadd.f32 %v1488_v60, %v1463_v31  ;;  %v1596_v49 = vpop.f32.mrf.mxu2 }
 0x265   : > { %v1515_v1 = vadd.f32 %v1514_v23, %v1489_v8 }
 0x267   : > { %v1727_v34 = vpop.f32.mrf.mxu1 }
 0x268   : > { %v1465_v16 = vpop.f32.mrf.mxu3  ;;  %v1728_v46 = vadd.f32 %v1727_v34, %v1701_v27 }
 0x269   : > { %v1466_v39 = vadd.f32 %v1465_v16, %v1439_v25 }
 0x26b   : > { %v1492_v22 = vadd.f32 %v1491_v28, %v1466_v39 }
 0x26d   : > { %v1518_v54 = vadd.f32 %v1517_v26, %v1492_v22 }
 0x26f   : > { %v1730_v33 = vpop.f32.mrf.mxu1 }
 0x270   : > { %v1616_v10 = vpop.f32.mrf.mxu3  ;;  %v1731_v59 = vadd.f32 %v1730_v33, %v1704_v44  ;;  %v3156_v44 = vld [vmem:[%s4670_s5 + $0x170] sm:$0xff] }
 0x271   : > { %v1617_v40 = vadd.f32 %v1616_v10, %v1590_v29 }
 0x273   : > { %v1625_v42 = vadd.f32 %v1617_v40, %v1512_v41 }
 0x275   : > { %v1733_v9 = vadd.f32 %v1725_v45, %v1625_v42 }
 0x277   : > { %v1740_v56 = vadd.f32 %v3282_v53, %v1733_v9  ;;  %v3141_v9 = vld [vmem:[%s4670_s5 + $0xf8] sm:$0xff] }
 0x278   : > { %v1619_v14 = vpop.f32.mrf.mxu3  ;;  %1924 = vmatpush.msra.mxu0 %v3141_v9  ;;  %v1878_v9 = vld [vmem:[%s4670_s5 + $0x68] sm:$0xff] }
 0x279   : > { %v1620_v35 = vadd.f32 %v1619_v14, %v1593_v32 }
 0x27b   : > { %v1626_v18 = vadd.f32 %v1620_v35, %v1515_v1 }
 0x27d   : > { %v1734_v50 = vadd.f32 %v1728_v46, %v1626_v18 }
 0x27f   : > { %v1741_v61 = vadd.f32 %v3282_v53, %v1734_v50 }
 0x280   : > { %v1622_v38 = vpop.f32.mrf.mxu3 }
 0x281   : > { %v1623_v57 = vadd.f32 %v1622_v38, %v1596_v49  ;;  %v1743_v6 = vadd.f32 %v1741_v61, %v1740_v56 }
 0x283   : > { %v1627_v62 = vadd.f32 %v1623_v57, %v1518_v54  ;;  %v3173_v54 = vld [vmem:[%s4670_s5 + $0x1f8] sm:$0xff]  ;;  %v3140_v57 = vld [vmem:[%s4670_s5 + $0xf0] sm:$0xff] }
 0x284   : > { %1925 = vmatpush.msra.mxu0 %v3140_v57  ;;  %v1875_v57 = vld [vmem:[%s4670_s5 + $0x50] sm:$0xff] }
 0x285   : > { %v1735_v0 = vadd.f32 %v1731_v59, %v1627_v62  ;;  %v3172_v59 = vld [vmem:[%s4670_s5 + $0x1f0] sm:$0xff]  ;;  %v3155_v62 = vld [vmem:[%s4670_s5 + $0x168] sm:$0xff] }
 0x287   : > { %v1742_v7 = vadd.f32 %v3282_v53, %v1735_v0  ;;  %v3157_v53 = vld [vmem:[%s4670_s5 + $0x178] sm:$0xff]  ;;  %v3154_v0 = vld [vmem:[%s4670_s5 + $0x160] sm:$0xff] }
 0x288   : > { %2030 = vmatpush.msrb.mxu1 %v3157_v53  ;;  %v1877_v53 = vld [vmem:[%s4670_s5 + $0x60] sm:$0xff] }
 0x289   : > { %v1744_v12 = vadd.f32 %v1743_v6, %v1742_v7  ;;  %v1797_v6 = vadd.s32 32, %v3407_v5 }
 0x28a   : > { %2031 = vmatpush.msrb.mxu1 %v3156_v44 }
 0x28b   : > { %v1745_v13 = vrot.slane %v1744_v12, 4  ;;  %vm1800_vm8 = vcmp.eq.s32.totalorder %v1797_v6, %v3661_v37  ;;  %v1874_v6 = vld [vmem:[%s4670_s5 + $0x48] sm:$0xff] }
 0x28c   : > { %2032 = vmatpush.msrb.mxu1 %v3155_v62 }
 0x28d   : > { %v1746_v17 = vadd.f32 %v1745_v13, %v1744_v12  ;;  %v3153_v12 = vld [vmem:[%s4670_s5 + $0x158] sm:$0xff] }
 0x28e   : > { %2033 = vmatpush.msrb.mxu1 %v3154_v0  ;;  %v3169_v13 = vld [vmem:[%s4670_s5 + $0x1d8] sm:$0xff] }
 0x28f   : > { %v1747_v19 = vrot.slane %v1746_v17, 2 }
 0x290   : > { %2034 = vmatpush.msrb.mxu1 %v3153_v12 }
 0x291   : > { %v1748_v55 = vadd.f32 %v1747_v19, %v1746_v17  ;;  %v3152_v17 = vld [vmem:[%s4670_s5 + $0x150] sm:$0xff] }
 0x292   : > { %v3168_v19 = vld [vmem:[%s4670_s5 + $0x1d0] sm:$0xff]  ;;  %2035 = vmatpush.msrb.mxu1 %v3152_v17 }
 0x293   : > { %v1749_v23 = vrot.slane %v1748_v55, 1  ;;  %v1871_v17 = vld [vmem:[%s4670_s5 + $0x30] sm:$0xff] }
 0x295   : > { %v1750_v60 = vadd.f32 %v1749_v23, %v1748_v55  ;;  %v3151_v55 = vld [vmem:[%s4670_s5 + $0x148] sm:$0xff] }
 0x296   : > { %v3167_v23 = vld [vmem:[%s4670_s5 + $0x1c8] sm:$0xff]  ;;  %2036 = vmatpush.msrb.mxu1 %v3151_v55 }
 0x297   : > { %v1758_v3 = vmul.f32 %v1757_v24, %v1750_v60  ;;  %v4202_v60 = vsel %vm1800_vm8, 1.0, %v3331_v4 }
 0x299   : > { %v1759_v25 = vsub.f32 %v1740_v56, %v1758_v3  ;;  %v1760_v26 = vsub.f32 %v1741_v61, %v1758_v3  ;;  %v1761_v28 = vsub.f32 %v1742_v7, %v1758_v3  ;;  %v3139_v61 = vld [vmem:[%s4670_s5 + $0xe8] sm:$0xff]  ;;  %v3138_v56 = vld [vmem:[%s4670_s5 + $0xe0] sm:$0xff] }
 0x29a   : > { %1926 = vmatpush.msra.mxu0 %v3139_v61  ;;  %v3170_v7 = vld [vmem:[%s4670_s5 + $0x1e0] sm:$0xff] }
 0x29b   : > { %v1762_v16 = vmul.f32 %v1759_v25, %v1759_v25  ;;  %v1763_v29 = vmul.f32 %v1760_v26, %v1760_v26  ;;  %v1764_v30 = vmul.f32 %v1761_v28, %v1761_v28  ;;  %v3150_v3 = vld [vmem:[%s4670_s5 + $0x140] sm:$0xff] }
 0x29c   : > { %1927 = vmatpush.msra.mxu0 %v3138_v56  ;;  %2037 = vmatpush.msrb.mxu1 %v3150_v3  ;;  %v1869_v3 = vld [vmem:[%s4670_s5 + $0x20] sm:$0xff] }
 0x29d   : > { %v1765_v2 = vadd.f32 %v1763_v29, %v1762_v16  ;;  %v3149_v16 = vld [vmem:[%s4670_s5 + $0x138] sm:$0xff] }
 0x29e   : > { %1928 = vmatpush.msra.mxu0 %v3137_v11  ;;  %v3165_v29 = vld [vmem:[%s4670_s5 + $0x1b8] sm:$0xff]  ;;  %2038 = vmatpush.msrb.mxu1 %v3149_v16 }
 0x29f   : > { %v1766_v10 = vadd.f32 %v1765_v2, %v1764_v30  ;;  %v3132_v30 = vld [vmem:[%s4670_s5 + $0xb0] sm:$0xff]  ;;  %v1868_v16 = vld [vmem:[%s4670_s5 + $0x18] sm:$0xff] }
 0x2a0   : > { %1929 = vmatpush.msra.mxu0 %v3136_v15  ;;  %v3148_v2 = vld [vmem:[%s4670_s5 + $0x130] sm:$0xff]  ;;  %v1872_v15 = vld [vmem:[%s4670_s5 + $0x38] sm:$0xff] }
 0x2a1   : > { %v1767_v31 = vrot.slane %v1766_v10, 4  ;;  %2039 = vmatpush.msrb.mxu1 %v3148_v2  ;;  %v1866_v2 = vld [vmem:[%s4670_s5 + $0x8] sm:$0xff] }
 0x2a2   : > { %1930 = vmatpush.msra.mxu0 %v3135_v21 }
 0x2a3   : > { %v1768_v20 = vadd.f32 %v1767_v31, %v1766_v10  ;;  %v3164_v10 = vld [vmem:[%s4670_s5 + $0x1b0] sm:$0xff] }
 0x2a5   : > { %v1769_v32 = vrot.slane %v1768_v20, 2 }
 0x2a7   : > { %v1770_v8 = vadd.f32 %v1769_v32, %v1768_v20  ;;  %v1799_v20 = vadd.s32 48, %v3407_v5 }
 0x2a9   : > { %v1771_v34 = vrot.slane %v1770_v8, 1  ;;  %vm1802_vm10 = vcmp.eq.s32.totalorder %v1799_v20, %v3661_v37 }
 0x2aa   : > { %v4240_v32 = vsel %vm1802_vm10, 1.0, %v3331_v4 }
 0x2ab   : > { %v1772_v36 = vadd.f32 %v1771_v34, %v1770_v8  ;;  %v3131_v8 = vld [vmem:[%s4670_s5 + $0xa8] sm:$0xff] }
 0x2ac   : > { %v3147_v34 = vld [vmem:[%s4670_s5 + $0x128] sm:$0xff] }
 0x2ad   : > { %v1773_v27 = vmul.f32 %v1772_v36, %v1757_v24  ;;  %v3134_v24 = vld [vmem:[%s4670_s5 + $0xc0] sm:$0xff]  ;;  %v3163_v36 = vld [vmem:[%s4670_s5 + $0x1a8] sm:$0xff]  ;;  %2040 = vmatpush.msrb.mxu1 %v3147_v34 }
 0x2ae   : > { %1931 = vmatpush.msra.mxu0 %v3134_v24  ;;  %v1870_v24 = vld [vmem:[%s4670_s5 + $0x28] sm:$0xff]  ;;  %v1865_v34 = vld [vmem:[%s4670_s5] sm:$0xff] }
 0x2af   : > { %v1774_v14 = vadd.f32 1e-05, %v1773_v27  ;;  %v3130_v27 = vld [vmem:[%s4670_s5 + $0xa0] sm:$0xff] }
 0x2b1   : > { %3293 = vrsqrt.f32 %v1774_v14  ;;  %vm1781_vm14 = vweird.f32 %v1774_v14 }
 0x2b7   : > { %v3294_v39 = vpop.eup %3293 }
 0x2b8   : > { %v1776_v40 = vmul.f32 %v3294_v39, %v1774_v14  ;;  %vm1782_vm13 = vweird.f32 %v3294_v39  ;;  %v3146_v14 = vld [vmem:[%s4670_s5 + $0x120] sm:$0xff] }
 0x2b9   : > { %vm1783_vm15 = vmor %vm1781_vm14, %vm1782_vm13  ;;  %2041 = vmatpush.msrb.mxu1 %v3146_v14 }
 0x2ba   : > { %v1777_v1 = vmul.f32 %v3294_v39, %v1776_v40  ;;  %v3129_v40 = vld [vmem:[%s4670_s5 + $0x98] sm:$0xff] }
 0x2bc   : > { %v1778_v35 = vmul.f32 0.5, %v1777_v1  ;;  %v3145_v1 = vld [vmem:[%s4670_s5 + $0x118] sm:$0xff] }
 0x2bd   : > { %2042 = vmatpush.msrb.mxu1 %v3145_v1 }
 0x2be   : > { %v1779_v41 = vsub.f32 1.5, %v1778_v35  ;;  %v3161_v35 = vld [vmem:[%s4670_s5 + $0x198] sm:$0xff] }
 0x2c0   : > { %v1780_v18 = vmul.f32 %v3294_v39, %v1779_v41  ;;  %v3128_v41 = vld [vmem:[%s4670_s5 + $0x90] sm:$0xff] }
 0x2c2   : > { %v1784_v43 = vsel %vm1783_vm15, %v3294_v39, %v1780_v18  ;;  %v3162_v39 = vld [vmem:[%s4670_s5 + $0x1a0] sm:$0xff]  ;;  %v3144_v18 = vld [vmem:[%s4670_s5 + $0x110] sm:$0xff] }
 0x2c3   : > { %v1787_v46 = vmul.f32 %v1784_v43, %v1761_v28  ;;  %v1786_v22 = vmul.f32 %v1784_v43, %v1760_v26  ;;  %v1785_v42 = vmul.f32 %v1784_v43, %v1759_v25  ;;  %v1798_v25 = vadd.s32 40, %v3407_v5  ;;  %v3166_v26 = vld [vmem:[%s4670_s5 + $0x1c0] sm:$0xff]  ;;  %v3133_v28 = vld [vmem:[%s4670_s5 + $0xb8] sm:$0xff]  ;;  %v3160_v43 = vld [vmem:[%s4670_s5 + $0x190] sm:$0xff]  ;;  %2043 = vmatpush.msrb.mxu1 %v3144_v18 }
 0x2c4   : > { %1932 = vmatpush.msra.mxu0 %v3133_v28 }
 0x2c5   : > { %vm1790_vm1 = vcmp.ge.f32.partialorder %v1787_v46, 0.0  ;;  %v1793_v45 = vmul.f32 0.2, %v1787_v46  ;;  %v1792_v49 = vmul.f32 0.2, %v1786_v22  ;;  %vm1789_vm2 = vcmp.ge.f32.partialorder %v1786_v22, 0.0 }
 0x2c6   : > { %v1791_v33 = vmul.f32 0.2, %v1785_v42  ;;  %vm1788_vm6 = vcmp.ge.f32.partialorder %v1785_v42, 0.0  ;;  %vm1801_vm9 = vcmp.eq.s32.totalorder %v1798_v25, %v3661_v37  ;;  %1933 = vmatpush.msra.mxu0 %v3132_v30 }
 0x2c7   : > { %v1796_v50 = vsel %vm1790_vm1, %v1787_v46, %v1793_v45  ;;  %v1795_v38 = vsel %vm1789_vm2, %v1786_v22, %v1792_v49  ;;  %v4233_v31 = vsel %vm1801_vm9, 1.0, %v3331_v4  ;;  %v3127_v46 = vld [vmem:[%s4670_s5 + $0x88] sm:$0xff]  ;;  %v3126_v45 = vld [vmem:[%s4670_s5 + $0x80] sm:$0xff]  ;;  %vm2273_vm9 = vcmask 392192  }
 0x2c8   : > { %1840 = vmatpush.msra.mxu2 %v1796_v50  ;;  %v1794_v52 = vsel %vm1788_vm6, %v1785_v42, %v1791_v33  ;;  %1934 = vmatpush.msra.mxu0 %v3131_v8  ;;  %v3143_v22 = vld [vmem:[%s4670_s5 + $0x108] sm:$0xff]  ;;  %v3142_v49 = vld [vmem:[%s4670_s5 + $0x100] sm:$0xff]  ;;  %v1880_v33 = vld [vmem:[%s4670_s5 + $0x78] sm:$0xff] }
 0x2c9   : > { %v3159_v42 = vld [vmem:[%s4670_s5 + $0x188] sm:$0xff]  ;;  %2044 = vmatpush.msrb.mxu1 %v3143_v22  ;;  %v3158_v50 = vld [vmem:[%s4670_s5 + $0x180] sm:$0xff] }
 0x2ca   : > { %1841 = vmatpush.msra.mxu2 %v1795_v38  ;;  %1935 = vmatpush.msra.mxu0 %v3130_v27  ;;  %v1879_v38 = vld [vmem:[%s4670_s5 + $0x70] sm:$0xff] }
 0x2cb   : > { %2045 = vmatpush.msrb.mxu1 %v3142_v49 }
 0x2cc   : > { %1842 = vmatpush.msra.mxu2 %v1794_v52  ;;  %1936 = vmatpush.msra.mxu0 %v3129_v40 }
 0x2cd   : > { %3119 = vmatmul.msk.f32.vlgmr.msra.gmra.mxu2 %vm1809_vm7, %v3667_v47 }
 0x2ce   : > { %2107 = vmatpush.msrb.mxu2 %v3173_v54  ;;  %1937 = vmatpush.msra.mxu0 %v3128_v41  ;;  %v1876_v54 = vld [vmem:[%s4670_s5 + $0x58] sm:$0xff] }
 0x2d0   : > { %2108 = vmatpush.msrb.mxu2 %v3172_v59  ;;  %1938 = vmatpush.msra.mxu0 %v3127_v46 }
 0x2d2   : > { %2109 = vmatpush.msrb.mxu2 %v3171_v63  ;;  %1939 = vmatpush.msra.mxu0 %v3126_v45 }
 0x2d4   : > { %2110 = vmatpush.msrb.mxu2 %v3170_v7  ;;  %1959 = vmatpush.msrb.mxu0 %v1880_v33  ;;  %v1873_v7 = vld [vmem:[%s4670_s5 + $0x40] sm:$0xff] }
 0x2d5   : > { %3120 = vmatmul.msk.f32.gmra.mxu2 %vm1809_vm7, %v3675_v48 }
 0x2d6   : > { %2111 = vmatpush.msrb.mxu2 %v3169_v13  ;;  %1960 = vmatpush.msrb.mxu0 %v1879_v38 }
 0x2d8   : > { %2112 = vmatpush.msrb.mxu2 %v3168_v19  ;;  %1961 = vmatpush.msrb.mxu0 %v1878_v9 }
 0x2da   : > { %2113 = vmatpush.msrb.mxu2 %v3167_v23  ;;  %1962 = vmatpush.msrb.mxu0 %v1877_v53 }
 0x2dc   : > { %2114 = vmatpush.msrb.mxu2 %v3166_v26  ;;  %1963 = vmatpush.msrb.mxu0 %v1876_v54 }
 0x2dd   : > { %3121 = vmatmul.msk.f32.gmra.mxu2 %vm1809_vm7, %v3682_v51 }
 0x2de   : > { %2115 = vmatpush.msrb.mxu2 %v3165_v29  ;;  %1964 = vmatpush.msrb.mxu0 %v1875_v57  ;;  %v1867_v29 = vld [vmem:[%s4670_s5 + $0x10] sm:$0xff] }
 0x2e0   : > { %2116 = vmatpush.msrb.mxu2 %v3164_v10  ;;  %1965 = vmatpush.msrb.mxu0 %v1874_v6 }
 0x2e2   : > { %2117 = vmatpush.msrb.mxu2 %v3163_v36  ;;  %1966 = vmatpush.msrb.mxu0 %v1873_v7 }
 0x2e4   : > { %2118 = vmatpush.msrb.mxu2 %v3162_v39  ;;  %1967 = vmatpush.msrb.mxu0 %v1872_v15 }
 0x2e5   : > { %3122 = vmatmul.msk.f32.gmra.mxu2 %vm1809_vm7, %v3689_v58 }
 0x2e6   : > { %2119 = vmatpush.msrb.mxu2 %v3161_v35  ;;  %1968 = vmatpush.msrb.mxu0 %v1871_v17 }
 0x2e8   : > { %2120 = vmatpush.msrb.mxu2 %v3160_v43  ;;  %1969 = vmatpush.msrb.mxu0 %v1870_v24 }
 0x2ea   : > { %2121 = vmatpush.msrb.mxu2 %v3159_v42  ;;  %1970 = vmatpush.msrb.mxu0 %v1869_v3 }
 0x2ec   : > { %2122 = vmatpush.msrb.mxu2 %v3158_v50  ;;  %1971 = vmatpush.msrb.mxu0 %v1868_v16 }
 0x2ed   : > { %3123 = vmatmul.msk.f32.gmra.mxu2 %vm1809_vm7, %v4202_v60 }
 0x2ee   : > { %1972 = vmatpush.msrb.mxu0 %v1867_v29 }
 0x2f0   : > { %1973 = vmatpush.msrb.mxu0 %v1866_v2 }
 0x2f2   : > { %1974 = vmatpush.msrb.mxu0 %v1865_v34 }
 0x2f5   : > { %3124 = vmatmul.msk.f32.gmra.mxu2 %vm1809_vm7, %v4233_v31 }
 0x2fd   : > { %3125 = vmatmul.msk.f32.gmra.mxu2 %vm1809_vm7, %v4240_v32 }
 0x350   : > { %v4304_v52 = vpop.f32.mrf.mxu2 }
 0x351   : > { %v2011_v44 = vrot.slane %v4304_v52, 2  ;;  %v2088_v59 = vrot.slane %v4304_v52, 3  ;;  %v1905_v0 = vrot.slane %v4304_v52, 1 }
 0x358   : > { %v4320_v61 = vpop.f32.mrf.mxu2 }
 0x359   : > { %v1906_v62 = vrot.slane %v4320_v61, 1  ;;  %v2012_v63 = vrot.slane %v4320_v61, 2  ;;  %v2089_v56 = vrot.slane %v4320_v61, 3 }
 0x35b   : > { %v1907_v11 = vsel %vm348_vm3, %v1905_v0, %v1906_v62  ;;  %v2013_v12 = vsel %vm469_vm4, %v2011_v44, %v2012_v63  ;;  %v2090_v13 = vsel %vm357_vm0, %v2088_v59, %v2089_v56 }
 0x35c   : > { %1940 = vmatmul.f32.vlgmr.msra.gmra.mxu0 %v1907_v11  ;;  %2046 = vmatmul.f32.vlgmr.msrb.gmra.mxu1 %v2013_v12 }
 0x35d   : > { %2123 = vmatmul.f32.vlgmr.msrb.gmra.mxu2 %v2090_v13 }
 0x360   : > { %v4341_v19 = vpop.f32.mrf.mxu2 }
 0x361   : > { %v2014_v21 = vrot.slane %v4341_v19, 2  ;;  %v2091_v55 = vrot.slane %v4341_v19, 3  ;;  %v1908_v23 = vrot.slane %v4341_v19, 1 }
 0x363   : > { %v1909_v25 = vsel %vm348_vm3, %v1906_v62, %v1908_v23  ;;  %v2015_v26 = vsel %vm469_vm4, %v2012_v63, %v2014_v21  ;;  %v2092_v28 = vsel %vm357_vm0, %v2089_v56, %v2091_v55 }
 0x364   : > { %1943 = vmatmul.f32.gmra.mxu0 %v1909_v25  ;;  %2049 = vmatmul.f32.gmra.mxu1 %v2015_v26 }
 0x365   : > { %2126 = vmatmul.f32.gmra.mxu2 %v2092_v28 }
 0x368   : > { %v1853_v30 = vpop.f32.mrf.mxu2 }
 0x369   : > { %v2016_v10 = vrot.slane %v1853_v30, 2  ;;  %v2093_v20 = vrot.slane %v1853_v30, 3  ;;  %v1910_v8 = vrot.slane %v1853_v30, 1 }
 0x36b   : > { %v1911_v36 = vsel %vm348_vm3, %v1908_v23, %v1910_v8  ;;  %v2017_v27 = vsel %vm469_vm4, %v2014_v21, %v2016_v10  ;;  %v2094_v14 = vsel %vm357_vm0, %v2091_v55, %v2093_v20 }
 0x36c   : > { %1946 = vmatmul.f32.gmra.mxu0 %v1911_v36  ;;  %2052 = vmatmul.f32.gmra.mxu1 %v2017_v27 }
 0x36d   : > { %2129 = vmatmul.f32.gmra.mxu2 %v2094_v14 }
 0x370   : > { %v1856_v39 = vpop.f32.mrf.mxu2 }
 0x371   : > { %v2018_v40 = vrot.slane %v1856_v39, 2  ;;  %v2095_v1 = vrot.slane %v1856_v39, 3  ;;  %v1912_v35 = vrot.slane %v1856_v39, 1 }
 0x373   : > { %v1913_v41 = vsel %vm348_vm3, %v1910_v8, %v1912_v35  ;;  %v2019_v18 = vsel %vm469_vm4, %v2016_v10, %v2018_v40  ;;  %v2096_v43 = vsel %vm357_vm0, %v2093_v20, %v2095_v1 }
 0x374   : > { %1949 = vmatmul.f32.gmra.mxu0 %v1913_v41  ;;  %2055 = vmatmul.f32.gmra.mxu1 %v2019_v18 }
 0x375   : > { %2132 = vmatmul.f32.gmra.mxu2 %v2096_v43 }
 0x378   : > { %v1859_v46 = vpop.f32.mrf.mxu2 }
 0x379   : > { %v2020_v22 = vrot.slane %v1859_v46, 2  ;;  %v2097_v42 = vrot.slane %v1859_v46, 3  ;;  %v1914_v45 = vrot.slane %v1859_v46, 1 }
 0x37b   : > { %v1915_v49 = vsel %vm348_vm3, %v1912_v35, %v1914_v45  ;;  %v2021_v50 = vsel %vm469_vm4, %v2018_v40, %v2020_v22  ;;  %v2098_v33 = vsel %vm357_vm0, %v2095_v1, %v2097_v42 }
 0x37c   : > { %1952 = vmatmul.f32.gmra.mxu0 %v1915_v49  ;;  %2058 = vmatmul.f32.gmra.mxu1 %v2021_v50  ;;  %v3334_v49 = vmov 48.0  }
 0x37d   : > { %2135 = vmatmul.f32.gmra.mxu2 %v2098_v33  ;;  %3295 = vrcp.f32 %v3334_v49 }
 0x380   : > { %v1862_v38 = vpop.f32.mrf.mxu2 }
 0x381   : > { %v1916_v9 = vrot.slane %v1862_v38, 1  ;;  %v2022_v53 = vrot.slane %v1862_v38, 2  ;;  %v2099_v54 = vrot.slane %v1862_v38, 3 }
 0x383   : > { %v1917_v57 = vsel %vm348_vm3, %v1914_v45, %v1916_v9  ;;  %v2023_v44 = vsel %vm469_vm4, %v2020_v22, %v2022_v53  ;;  %v2100_v59 = vsel %vm357_vm0, %v2097_v42, %v2099_v54  ;;  %v3296_v54 = vpop.eup %3295 }
 0x384   : > { %1955 = vmatmul.f32.gmra.mxu0 %v1917_v57  ;;  %2061 = vmatmul.f32.gmra.mxu1 %v2023_v44  ;;  %vm2181_vm12 = vweird.f32 %v3296_v54 }
 0x385   : > { %2138 = vmatmul.f32.gmra.mxu2 %v2100_v59 }
 0x38c   : > { %1975 = vmatmul.f32.vlgmr.msrb.gmra.mxu0 %v4304_v52 }
 0x394   : > { %1978 = vmatmul.f32.gmra.mxu0 %v4320_v61 }
 0x39c   : > { %1981 = vmatmul.f32.gmra.mxu0 %v4341_v19  ;;  %v3283_v19 = vld [vmem:[%s4671_s6] ss:$0 sm:$0xff] }
 0x3a4   : > { %1984 = vmatmul.f32.gmra.mxu0 %v1853_v30 }
 0x3ac   : > { %1987 = vmatmul.f32.gmra.mxu0 %v1856_v39 }
 0x3b4   : > { %1990 = vmatmul.f32.gmra.mxu0 %v1859_v46 }
 0x3d9   : > { %v1941_v62 = vpop.f32.mrf.mxu0  ;;  %v2047_v7 = vpop.f32.mrf.mxu1 }
 0x3e0   : > { %v2124_v12 = vpop.f32.mrf.mxu2 }
 0x3e1   : > { %v1944_v63 = vpop.f32.mrf.mxu0  ;;  %v2050_v17 = vpop.f32.mrf.mxu1 }
 0x3e8   : > { %v2127_v21 = vpop.f32.mrf.mxu2 }
 0x3e9   : > { %v1947_v56 = vpop.f32.mrf.mxu0  ;;  %v2053_v3 = vpop.f32.mrf.mxu1 }
 0x3f0   : > { %v2130_v28 = vpop.f32.mrf.mxu2 }
 0x3f1   : > { %v1950_v0 = vpop.f32.mrf.mxu0  ;;  %v2056_v36 = vpop.f32.mrf.mxu1 }
 0x3f8   : > { %v2133_v14 = vpop.f32.mrf.mxu2 }
 0x3f9   : > { %v1953_v6 = vpop.f32.mrf.mxu0  ;;  %v2059_v18 = vpop.f32.mrf.mxu1 }
 0x400   : > { %v2136_v22 = vpop.f32.mrf.mxu2 }
 0x401   : > { %v1956_v11 = vpop.f32.mrf.mxu0  ;;  %v2062_v57 = vpop.f32.mrf.mxu1 }
 0x409   : > { %v1976_v13 = vpop.f32.mrf.mxu0 }
 0x40a   : > { %v1977_v15 = vadd.f32 %v1976_v13, %v1941_v62  ;;  %v2139_v62 = vpop.f32.mrf.mxu2 }
 0x40c   : > { %v2065_v52 = vadd.f32 %v2047_v7, %v1977_v15 }
 0x40e   : > { %v2142_v61 = vadd.f32 %v2124_v12, %v2065_v52 }
 0x410   : > { %v2152_v25 = vadd.f32 %v3283_v19, %v2142_v61 }
 0x411   : > { %v1979_v55 = vpop.f32.mrf.mxu0 }
 0x412   : > { %v1980_v23 = vadd.f32 %v1979_v55, %v1944_v63  ;;  %v2159_v30 = vsel %vm2158_vm11, %v2152_v25, 0.0 }
 0x414   : > { %v2066_v24 = vadd.f32 %v2050_v17, %v1980_v23 }
 0x416   : > { %v2143_v26 = vadd.f32 %v2127_v21, %v2066_v24 }
 0x418   : > { %v2153_v16 = vadd.f32 %v3283_v19, %v2143_v26 }
 0x419   : > { %v1982_v29 = vpop.f32.mrf.mxu0 }
 0x41a   : > { %v2160_v2 = vsel %vm2158_vm11, %v2153_v16, 0.0  ;;  %v1983_v10 = vadd.f32 %v1982_v29, %v1947_v56 }
 0x41b   : > { %v2161_v20 = vadd.f32 %v2160_v2, %v2159_v30 }
 0x41c   : > { %v2067_v8 = vadd.f32 %v2053_v3, %v1983_v10 }
 0x41e   : > { %v2144_v34 = vadd.f32 %v2130_v28, %v2067_v8 }
 0x420   : > { %v2154_v27 = vadd.f32 %v3283_v19, %v2144_v34 }
 0x421   : > { %v1985_v39 = vpop.f32.mrf.mxu0 }
 0x422   : > { %v2162_v40 = vsel %vm2158_vm11, %v2154_v27, 0.0  ;;  %v1986_v35 = vadd.f32 %v1985_v39, %v1950_v0  ;;  %v2177_v0 = vmul.f32 48.0, %v3296_v54 }
 0x423   : > { %v2163_v1 = vadd.f32 %v2162_v40, %v2161_v20 }
 0x424   : > { %v2068_v41 = vadd.f32 %v2056_v36, %v1986_v35  ;;  %v2178_v15 = vsub.f32 1.0, %v2177_v0 }
 0x426   : > { %v2145_v42 = vadd.f32 %v2133_v14, %v2068_v41  ;;  %v2179_v52 = vmul.f32 %v3296_v54, %v2178_v15 }
 0x428   : > { %v2155_v33 = vadd.f32 %v3283_v19, %v2145_v42  ;;  %v2180_v61 = vadd.f32 %v3296_v54, %v2179_v52 }
 0x429   : > { %v1988_v43 = vpop.f32.mrf.mxu0 }
 0x42a   : > { %v1989_v46 = vadd.f32 %v1988_v43, %v1953_v6  ;;  %v2164_v44 = vsel %vm2158_vm11, %v2155_v33, 0.0  ;;  %v2182_v3 = vsel %vm2181_vm12, %v3296_v54, %v2180_v61 }
 0x42b   : > { %v2165_v6 = vadd.f32 %v2164_v44, %v2163_v1 }
 0x42c   : > { %v2069_v45 = vadd.f32 %v2059_v18, %v1989_v46 }
 0x42e   : > { %v2146_v50 = vadd.f32 %v2136_v22, %v2069_v45 }
 0x430   : > { %v2156_v9 = vadd.f32 %v3283_v19, %v2146_v50 }
 0x431   : > { %v1991_v38 = vpop.f32.mrf.mxu0 }
 0x432   : > { %v1992_v53 = vadd.f32 %v1991_v38, %v1956_v11  ;;  %v2166_v63 = vsel %vm2158_vm11, %v2156_v9, 0.0 }
 0x433   : > { %v2167_v12 = vadd.f32 %v2166_v63, %v2165_v6 }
 0x434   : > { %v2070_v59 = vadd.f32 %v2062_v57, %v1992_v53 }
 0x436   : > { %v2147_v56 = vadd.f32 %v2139_v62, %v2070_v59 }
 0x438   : > { %v2157_v7 = vadd.f32 %v3283_v19, %v2147_v56 }
 0x43a   : > { %v2168_v13 = vsel %vm2158_vm11, %v2157_v7, 0.0 }
 0x43b   : > { %v2169_v17 = vadd.f32 %v2168_v13, %v2167_v12 }
 0x43d   : > { %v2170_v21 = vrot.slane %v2169_v17, 4 }
 0x43f   : > { %v2171_v11 = vadd.f32 %v2170_v21, %v2169_v17 }
 0x441   : > { %v2172_v55 = vrot.slane %v2171_v11, 2 }
 0x443   : > { %v2173_v23 = vadd.f32 %v2172_v55, %v2171_v11 }
 0x445   : > { %v2174_v24 = vrot.slane %v2173_v23, 1 }
 0x447   : > { %v2175_v26 = vadd.f32 %v2174_v24, %v2173_v23 }
 0x449   : > { %v2183_v28 = vmul.f32 %v2182_v3, %v2175_v26 }
 0x44b   : > { %v2184_v29 = vsub.f32 %v2152_v25, %v2183_v28  ;;  %v2185_v30 = vsub.f32 %v2153_v16, %v2183_v28  ;;  %v2186_v2 = vsub.f32 %v2154_v27, %v2183_v28  ;;  %v2187_v19 = vsub.f32 %v2155_v33, %v2183_v28 }
 0x44c   : > { %v2188_v10 = vsub.f32 %v2156_v9, %v2183_v28  ;;  %v2189_v36 = vsub.f32 %v2157_v7, %v2183_v28 }
 0x44d   : > { %v2190_v20 = vmul.f32 %v2184_v29, %v2184_v29  ;;  %v2191_v8 = vmul.f32 %v2185_v30, %v2185_v30  ;;  %v2192_v34 = vmul.f32 %v2186_v2, %v2186_v2  ;;  %v2193_v14 = vmul.f32 %v2187_v19, %v2187_v19 }
 0x44e   : > { %v2194_v35 = vmul.f32 %v2188_v10, %v2188_v10  ;;  %v2195_v43 = vmul.f32 %v2189_v36, %v2189_v36 }
 0x44f   : > { %v2196_v39 = vsel %vm2158_vm11, %v2190_v20, 0.0  ;;  %v2197_v40 = vsel %vm2158_vm11, %v2191_v8, 0.0  ;;  %v2199_v41 = vsel %vm2158_vm11, %v2192_v34, 0.0  ;;  %v2201_v25 = vsel %vm2158_vm11, %v2193_v14, 0.0  ;;  %v3232_v20 = vld [vmem:[%s4672_s7 + $0xb8] sm:$0xff]  ;;  %v3199_v14 = vld [vmem:[%s4672_s7 + $0x70] sm:$0xff] }
 0x450   : > { %v2198_v1 = vadd.f32 %v2197_v40, %v2196_v39  ;;  %v2203_v27 = vsel %vm2158_vm11, %v2194_v35, 0.0  ;;  %v2205_v22 = vsel %vm2158_vm11, %v2195_v43, 0.0  ;;  %v3200_v8 = vld [vmem:[%s4672_s7 + $0x78] sm:$0xff]  ;;  %2637 = vmatpush.msra.mxu2 %v3232_v20  ;;  %v2368_v39 = vld [vmem:[%s4672_s7 + $0x30] sm:$0xff]  ;;  %v3198_v35 = vld [vmem:[%s4672_s7 + $0x68] sm:$0xff] }
 0x451   : > { %v2369_v34 = vld [vmem:[%s4672_s7 + $0x38] sm:$0xff]  ;;  %2449 = vmatpush.msra.mxu0 %v3200_v8  ;;  %v3247_v40 = vld [vmem:[%s4672_s7 + $0xd0] sm:$0xff] }
 0x452   : > { %v2200_v18 = vadd.f32 %v2199_v41, %v2198_v1  ;;  %2526 = vmatpush.msra.mxu1 %v2369_v34  ;;  %v3230_v1 = vld [vmem:[%s4672_s7 + $0xa8] sm:$0xff] }
 0x453   : > { %v2367_v41 = vld [vmem:[%s4672_s7 + $0x28] sm:$0xff]  ;;  %2450 = vmatpush.msra.mxu0 %v3199_v14 }
 0x454   : > { %v2202_v16 = vadd.f32 %v2201_v25, %v2200_v18  ;;  %2527 = vmatpush.msra.mxu1 %v2368_v39  ;;  %v3229_v18 = vld [vmem:[%s4672_s7 + $0xa0] sm:$0xff]  ;;  %v2252_v25 = vadd.s32 80, %v3407_v5 }
 0x455   : > { %2451 = vmatpush.msra.mxu0 %v3198_v35 }
 0x456   : > { %v2204_v46 = vadd.f32 %v2203_v27, %v2202_v16  ;;  %2528 = vmatpush.msra.mxu1 %v2367_v41  ;;  %v2253_v27 = vadd.s32 88, %v3407_v5 }
 0x458   : > { %v2206_v42 = vadd.f32 %v2205_v22, %v2204_v46  ;;  %v2254_v22 = vadd.s32 96, %v3407_v5 }
 0x45a   : > { %v2207_v45 = vrot.slane %v2206_v42, 4 }
 0x45c   : > { %v2208_v49 = vadd.f32 %v2207_v45, %v2206_v42  ;;  %v2366_v45 = vld [vmem:[%s4672_s7 + $0x20] sm:$0xff] }
 0x45d   : > { %2529 = vmatpush.msra.mxu1 %v2366_v45 }
 0x45e   : > { %v2209_v50 = vrot.slane %v2208_v49, 2 }
 0x460   : > { %v2210_v33 = vadd.f32 %v2209_v50, %v2208_v49  ;;  %v2365_v49 = vld [vmem:[%s4672_s7 + $0x18] sm:$0xff] }
 0x461   : > { %2530 = vmatpush.msra.mxu1 %v2365_v49  ;;  %v3228_v50 = vld [vmem:[%s4672_s7 + $0x98] sm:$0xff] }
 0x462   : > { %v2211_v38 = vrot.slane %v2210_v33, 1 }
 0x464   : > { %v2212_v9 = vadd.f32 %v2211_v38, %v2210_v33  ;;  %v3246_v33 = vld [vmem:[%s4672_s7 + $0xc8] sm:$0xff]  ;;  %v3196_v38 = vld [vmem:[%s4672_s7 + $0x58] sm:$0xff] }
 0x466   : > { %v2213_v53 = vmul.f32 %v2212_v9, %v2182_v3  ;;  %v3227_v9 = vld [vmem:[%s4672_s7 + $0x90] sm:$0xff] }
 0x468   : > { %v2214_v54 = vadd.f32 1e-05, %v2213_v53  ;;  %v2362_v53 = vld [vmem:[%s4672_s7] sm:$0xff] }
 0x46a   : > { %3297 = vrsqrt.f32 %v2214_v54  ;;  %vm2221_vm13 = vweird.f32 %v2214_v54 }
 0x470   : > { %v3298_v57 = vpop.eup %3297 }
 0x471   : > { %v2216_v44 = vmul.f32 %v3298_v57, %v2214_v54  ;;  %vm2222_vm5 = vweird.f32 %v3298_v57  ;;  %v3226_v54 = vld [vmem:[%s4672_s7 + $0x88] sm:$0xff] }
 0x472   : > { %vm2223_vm14 = vmor %vm2221_vm13, %vm2222_vm5  ;;  %vm2258_vm13 = vcmp.eq.s32.totalorder %v2252_v25, %v3661_v37 }
 0x473   : > { %v2217_v59 = vmul.f32 %v3298_v57, %v2216_v44  ;;  %v3177_v16 = vsel %vm2258_vm13, 1.0, %v3331_v4  ;;  %v3225_v44 = vld [vmem:[%s4672_s7 + $0x80] sm:$0xff] }
 0x475   : > { %v2218_v62 = vmul.f32 0.5, %v2217_v59  ;;  %v3194_v59 = vld [vmem:[%s4672_s7 + $0x48] sm:$0xff] }
 0x477   : > { %v2219_v63 = vsub.f32 1.5, %v2218_v62  ;;  %v3245_v62 = vld [vmem:[%s4672_s7 + $0xc0] sm:$0xff] }
 0x479   : > { %v2220_v56 = vmul.f32 %v3298_v57, %v2219_v63  ;;  %v3193_v63 = vld [vmem:[%s4672_s7 + $0x40] sm:$0xff] }
 0x47b   : > { %v2224_v0 = vsel %vm2223_vm14, %v3298_v57, %v2220_v56  ;;  %vm2259_vm14 = vcmp.eq.s32.totalorder %v2253_v27, %v3661_v37  ;;  %v3195_v57 = vld [vmem:[%s4672_s7 + $0x50] sm:$0xff] }
 0x47c   : > { %v2230_v6 = vmul.f32 %v2224_v0, %v2189_v36  ;;  %v2229_v7 = vmul.f32 %v2224_v0, %v2188_v10  ;;  %v2228_v12 = vmul.f32 %v2224_v0, %v2187_v19  ;;  %v2227_v13 = vmul.f32 %v2224_v0, %v2186_v2  ;;  %v3252_v2 = vld [vmem:[%s4672_s7 + $0xf8] sm:$0xff]  ;;  %v3231_v36 = vld [vmem:[%s4672_s7 + $0xb0] sm:$0xff] }
 0x47d   : > { %v2226_v15 = vmul.f32 %v2224_v0, %v2185_v30  ;;  %v2225_v17 = vmul.f32 %v2224_v0, %v2184_v29  ;;  %v2251_v19 = vadd.s32 72, %v3407_v5  ;;  %v3248_v10 = vld [vmem:[%s4672_s7 + $0xd8] sm:$0xff]  ;;  %2638 = vmatpush.msra.mxu2 %v3231_v36  ;;  %v3178_v46 = vsel %vm2259_vm14, 1.0, %v3331_v4 }
 0x47e   : > { %vm2236_vm15 = vcmp.ge.f32.partialorder %v2230_v6, 0.0  ;;  %v2242_v21 = vmul.f32 0.2, %v2230_v6  ;;  %v2241_v52 = vmul.f32 0.2, %v2229_v7  ;;  %vm2235_vm1 = vcmp.ge.f32.partialorder %v2229_v7, 0.0 }
 0x47f   : > { %v2240_v55 = vmul.f32 0.2, %v2228_v12  ;;  %vm2234_vm2 = vcmp.ge.f32.partialorder %v2228_v12, 0.0  ;;  %v2239_v23 = vmul.f32 0.2, %v2227_v13  ;;  %vm2233_vm6 = vcmp.ge.f32.partialorder %v2227_v13, 0.0  ;;  %2639 = vmatpush.msra.mxu2 %v3230_v1 }
 0x480   : > { %v2248_v11 = vsel %vm2236_vm15, %v2230_v6, %v2242_v21  ;;  %v2247_v61 = vsel %vm2235_vm1, %v2229_v7, %v2241_v52  ;;  %v2238_v3 = vmul.f32 0.2, %v2226_v15  ;;  %vm2232_vm7 = vcmp.ge.f32.partialorder %v2226_v15, 0.0 }
 0x481   : > { %2316 = vmatpush.msra.mxu3 %v2248_v11  ;;  %v2246_v24 = vsel %vm2234_vm2, %v2228_v12, %v2240_v55  ;;  %v2245_v26 = vsel %vm2233_vm6, %v2227_v13, %v2239_v23  ;;  %v2237_v28 = vmul.f32 0.2, %v2225_v17  ;;  %vm2231_vm8 = vcmp.ge.f32.partialorder %v2225_v17, 0.0  ;;  %2640 = vmatpush.msra.mxu2 %v3229_v18 }
 0x482   : > { %v2244_v29 = vsel %vm2232_vm7, %v2226_v15, %v2238_v3  ;;  %vm2257_vm5 = vcmp.eq.s32.totalorder %v2251_v19, %v3661_v37  ;;  %vm2260_vm15 = vcmp.eq.s32.totalorder %v2254_v22, %v3661_v37 }
 0x483   : > { %2317 = vmatpush.msra.mxu3 %v2247_v61  ;;  %v2243_v30 = vsel %vm2231_vm8, %v2225_v17, %v2237_v28  ;;  %v3176_v43 = vsel %vm2257_vm5, 1.0, %v3331_v4  ;;  %v3179_v42 = vsel %vm2260_vm15, 1.0, %v3331_v4  ;;  %2641 = vmatpush.msra.mxu2 %v3228_v50 }
 0x485   : > { %2318 = vmatpush.msra.mxu3 %v2246_v24  ;;  %2642 = vmatpush.msra.mxu2 %v3227_v9 }
 0x487   : > { %2319 = vmatpush.msra.mxu3 %v2245_v26  ;;  %2643 = vmatpush.msra.mxu2 %v3226_v54 }
 0x489   : > { %2320 = vmatpush.msra.mxu3 %v2244_v29  ;;  %2644 = vmatpush.msra.mxu2 %v3225_v44 }
 0x48b   : > { %2321 = vmatpush.msra.mxu3 %v2243_v30 }
 0x48c   : > { %3180 = vmatmul.msk.f32.vlgmr.msra.gmra.mxu3 %vm2273_vm9, %v3667_v47  ;;  %v3251_v47 = vld [vmem:[%s4672_s7 + $0xf0] sm:$0xff] }
 0x48d   : > { %2760 = vmatpush.msrb.mxu3 %v3252_v2 }
 0x48f   : > { %2761 = vmatpush.msrb.mxu3 %v3251_v47 }
 0x494   : > { %3181 = vmatmul.msk.f32.gmra.mxu3 %vm2273_vm9, %v3675_v48  ;;  %v2249_v48 = vadd.s32 56, %v3407_v5 }
 0x496   : > { %vm2255_vm10 = vcmp.eq.s32.totalorder %v2249_v48, %v3661_v37 }
 0x49c   : > { %3182 = vmatmul.msk.f32.gmra.mxu3 %vm2273_vm9, %v3682_v51  ;;  %v3250_v51 = vld [vmem:[%s4672_s7 + $0xe8] sm:$0xff] }
 0x49d   : > { %2762 = vmatpush.msrb.mxu3 %v3250_v51 }
 0x4a4   : > { %3183 = vmatmul.msk.f32.gmra.mxu3 %vm2273_vm9, %v3689_v58  ;;  %v3174_v58 = vsel %vm2255_vm10, 1.0, %v3331_v4 }
 0x4ac   : > { %3184 = vmatmul.msk.f32.gmra.mxu3 %vm2273_vm9, %v4202_v60  ;;  %v2250_v60 = vadd.s32 64, %v3407_v5  ;;  %v2364_v5 = vld [vmem:[%s4672_s7 + $0x10] sm:$0xff] }
 0x4ad   : > { %2531 = vmatpush.msra.mxu1 %v2364_v5 }
 0x4ae   : > { %vm2256_vm12 = vcmp.eq.s32.totalorder %v2250_v60, %v3661_v37  ;;  %v3197_v37 = vld [vmem:[%s4672_s7 + $0x60] sm:$0xff] }
 0x4af   : > { %2452 = vmatpush.msra.mxu0 %v3197_v37 }
 0x4b1   : > { %2453 = vmatpush.msra.mxu0 %v3196_v38 }
 0x4b3   : > { %2454 = vmatpush.msra.mxu0 %v3195_v57 }
 0x4b4   : > { %3185 = vmatmul.msk.f32.gmra.mxu3 %vm2273_vm9, %v4233_v31  ;;  %v3249_v31 = vld [vmem:[%s4672_s7 + $0xe0] sm:$0xff] }
 0x4b5   : > { %2763 = vmatpush.msrb.mxu3 %v3249_v31  ;;  %2455 = vmatpush.msra.mxu0 %v3194_v59 }
 0x4b7   : > { %2764 = vmatpush.msrb.mxu3 %v3248_v10  ;;  %2456 = vmatpush.msra.mxu0 %v3193_v63 }
 0x4b9   : > { %2765 = vmatpush.msrb.mxu3 %v3247_v40 }
 0x4bb   : > { %2766 = vmatpush.msrb.mxu3 %v3246_v33 }
 0x4bc   : > { %3186 = vmatmul.msk.f32.gmra.mxu3 %vm2273_vm9, %v4240_v32  ;;  %v3175_v32 = vsel %vm2256_vm12, 1.0, %v3331_v4  ;;  %v2363_v4 = vld [vmem:[%s4672_s7 + $0x8] sm:$0xff] }
 0x4bd   : > { %2532 = vmatpush.msra.mxu1 %v2363_v4  ;;  %2767 = vmatpush.msrb.mxu3 %v3245_v62 }
 0x4bf   : > { %2533 = vmatpush.msra.mxu1 %v2362_v53 }
 0x4c4   : > { %3187 = vmatmul.msk.f32.gmra.mxu3 %vm2273_vm9, %v3174_v58 }
 0x4cc   : > { %3188 = vmatmul.msk.f32.gmra.mxu3 %vm2273_vm9, %v3175_v32 }
 0x4d4   : > { %3189 = vmatmul.msk.f32.gmra.mxu3 %vm2273_vm9, %v3176_v43 }
 0x4dc   : > { %3190 = vmatmul.msk.f32.gmra.mxu3 %vm2273_vm9, %v3177_v16 }
 0x4e4   : > { %3191 = vmatmul.msk.f32.gmra.mxu3 %vm2273_vm9, %v3178_v46 }
 0x4ec   : > { %3192 = vmatmul.msk.f32.gmra.mxu3 %vm2273_vm9, %v3179_v42 }
 0x50f   : > { %v2323_v56 = vpop.f32.mrf.mxu3 }
 0x510   : > { %3213 = vmatmul.msk.f32.vlgmr.msra.gmra.mxu1 %vm2158_vm11, %v2323_v56  ;;  %v2392_v0 = vrot.slane %v2323_v56, 1  ;;  %v2580_v6 = vrot.slane %v2323_v56, 2  ;;  %v2703_v12 = vrot.slane %v2323_v56, 3 }
 0x517   : > { %v2326_v7 = vpop.f32.mrf.mxu3 }
 0x518   : > { %v2393_v13 = vrot.slane %v2326_v7, 1  ;;  %v2581_v15 = vrot.slane %v2326_v7, 2  ;;  %v2704_v17 = vrot.slane %v2326_v7, 3  ;;  %3214 = vmatmul.msk.f32.gmra.mxu1 %vm2158_vm11, %v2326_v7 }
 0x51a   : > { %v2582_v21 = vsel %vm469_vm4, %v2580_v6, %v2581_v15  ;;  %v2705_v52 = vsel %vm357_vm0, %v2703_v12, %v2704_v17  ;;  %v2394_v11 = vsel %vm348_vm3, %v2392_v0, %v2393_v13 }
 0x51b   : > { %3233 = vmatmul.msk.f32.vlgmr.msra.gmra.mxu2 %vm2158_vm11, %v2582_v21  ;;  %3253 = vmatmul.msk.f32.vlgmr.msrb.gmra.mxu3 %vm2158_vm11, %v2705_v52 }
 0x51c   : > { %3201 = vmatmul.msk.f32.vlgmr.msra.gmra.mxu0 %vm2158_vm11, %v2394_v11 }
 0x51f   : > { %v2329_v55 = vpop.f32.mrf.mxu3 }
 0x520   : > { %v2395_v61 = vrot.slane %v2329_v55, 1  ;;  %v2583_v23 = vrot.slane %v2329_v55, 2  ;;  %v2706_v24 = vrot.slane %v2329_v55, 3  ;;  %3215 = vmatmul.msk.f32.gmra.mxu1 %vm2158_vm11, %v2329_v55 }
 0x522   : > { %v2584_v3 = vsel %vm469_vm4, %v2581_v15, %v2583_v23  ;;  %v2707_v26 = vsel %vm357_vm0, %v2704_v17, %v2706_v24  ;;  %v2396_v28 = vsel %vm348_vm3, %v2393_v13, %v2395_v61 }
 0x523   : > { %3234 = vmatmul.msk.f32.gmra.mxu2 %vm2158_vm11, %v2584_v3  ;;  %3254 = vmatmul.msk.f32.gmra.mxu3 %vm2158_vm11, %v2707_v26 }
 0x524   : > { %3202 = vmatmul.msk.f32.gmra.mxu0 %vm2158_vm11, %v2396_v28 }
 0x527   : > { %v2332_v29 = vpop.f32.mrf.mxu3 }
 0x528   : > { %v2397_v30 = vrot.slane %v2332_v29, 1  ;;  %v2585_v2 = vrot.slane %v2332_v29, 2  ;;  %v2708_v47 = vrot.slane %v2332_v29, 3  ;;  %3216 = vmatmul.msk.f32.gmra.mxu1 %vm2158_vm11, %v2332_v29 }
 0x52a   : > { %v2586_v48 = vsel %vm469_vm4, %v2583_v23, %v2585_v2  ;;  %v2709_v51 = vsel %vm357_vm0, %v2706_v24, %v2708_v47  ;;  %v2398_v58 = vsel %vm348_vm3, %v2395_v61, %v2397_v30 }
 0x52b   : > { %3235 = vmatmul.msk.f32.gmra.mxu2 %vm2158_vm11, %v2586_v48  ;;  %3255 = vmatmul.msk.f32.gmra.mxu3 %vm2158_vm11, %v2709_v51 }
 0x52c   : > { %3203 = vmatmul.msk.f32.gmra.mxu0 %vm2158_vm11, %v2398_v58 }
 0x52f   : > { %v2335_v60 = vpop.f32.mrf.mxu3 }
 0x530   : > { %v2399_v31 = vrot.slane %v2335_v60, 1  ;;  %v2587_v32 = vrot.slane %v2335_v60, 2  ;;  %v2710_v19 = vrot.slane %v2335_v60, 3  ;;  %3217 = vmatmul.msk.f32.gmra.mxu1 %vm2158_vm11, %v2335_v60 }
 0x532   : > { %v2588_v10 = vsel %vm469_vm4, %v2585_v2, %v2587_v32  ;;  %v2711_v20 = vsel %vm357_vm0, %v2708_v47, %v2710_v19  ;;  %v2400_v8 = vsel %vm348_vm3, %v2397_v30, %v2399_v31 }
 0x533   : > { %3236 = vmatmul.msk.f32.gmra.mxu2 %vm2158_vm11, %v2588_v10  ;;  %3256 = vmatmul.msk.f32.gmra.mxu3 %vm2158_vm11, %v2711_v20 }
 0x534   : > { %3204 = vmatmul.msk.f32.gmra.mxu0 %vm2158_vm11, %v2400_v8 }
 0x537   : > { %v2338_v34 = vpop.f32.mrf.mxu3 }
 0x538   : > { %v2401_v36 = vrot.slane %v2338_v34, 1  ;;  %v2589_v14 = vrot.slane %v2338_v34, 2  ;;  %v2712_v39 = vrot.slane %v2338_v34, 3  ;;  %3218 = vmatmul.msk.f32.gmra.mxu1 %vm2158_vm11, %v2338_v34  ;;  %v4618_v34 = vld [vmem:[%s4673_s8] ss:$0 sm:$0xff] }
 0x53a   : > { %v2590_v40 = vsel %vm469_vm4, %v2587_v32, %v2589_v14  ;;  %v2713_v1 = vsel %vm357_vm0, %v2710_v19, %v2712_v39  ;;  %v2402_v35 = vsel %vm348_vm3, %v2399_v31, %v2401_v36 }
 0x53b   : > { %3237 = vmatmul.msk.f32.gmra.mxu2 %vm2158_vm11, %v2590_v40  ;;  %3257 = vmatmul.msk.f32.gmra.mxu3 %vm2158_vm11, %v2713_v1 }
 0x53c   : > { %3205 = vmatmul.msk.f32.gmra.mxu0 %vm2158_vm11, %v2402_v35 }
 0x53f   : > { %v2341_v41 = vpop.f32.mrf.mxu3 }
 0x540   : > { %v2403_v18 = vrot.slane %v2341_v41, 1  ;;  %v2591_v43 = vrot.slane %v2341_v41, 2  ;;  %v2714_v25 = vrot.slane %v2341_v41, 3  ;;  %3219 = vmatmul.msk.f32.gmra.mxu1 %vm2158_vm11, %v2341_v41 }
 0x542   : > { %v2592_v16 = vsel %vm469_vm4, %v2589_v14, %v2591_v43  ;;  %v2715_v27 = vsel %vm357_vm0, %v2712_v39, %v2714_v25  ;;  %v2404_v46 = vsel %vm348_vm3, %v2401_v36, %v2403_v18 }
 0x543   : > { %3238 = vmatmul.msk.f32.gmra.mxu2 %vm2158_vm11, %v2592_v16  ;;  %3258 = vmatmul.msk.f32.gmra.mxu3 %vm2158_vm11, %v2715_v27 }
 0x544   : > { %3206 = vmatmul.msk.f32.gmra.mxu0 %vm2158_vm11, %v2404_v46 }
 0x547   : > { %v2344_v22 = vpop.f32.mrf.mxu3 }
 0x548   : > { %v2405_v42 = vrot.slane %v2344_v22, 1  ;;  %v2593_v45 = vrot.slane %v2344_v22, 2  ;;  %v2716_v49 = vrot.slane %v2344_v22, 3  ;;  %3220 = vmatmul.msk.f32.gmra.mxu1 %vm2158_vm11, %v2344_v22 }
 0x54a   : > { %v2594_v5 = vsel %vm469_vm4, %v2591_v43, %v2593_v45  ;;  %v2717_v4 = vsel %vm357_vm0, %v2714_v25, %v2716_v49  ;;  %v2406_v37 = vsel %vm348_vm3, %v2403_v18, %v2405_v42 }
 0x54b   : > { %3239 = vmatmul.msk.f32.gmra.mxu2 %vm2158_vm11, %v2594_v5  ;;  %3259 = vmatmul.msk.f32.gmra.mxu3 %vm2158_vm11, %v2717_v4 }
 0x54c   : > { %3207 = vmatmul.msk.f32.gmra.mxu0 %vm2158_vm11, %v2406_v37 }
 0x54f   : > { %v2347_v50 = vpop.f32.mrf.mxu3 }
 0x550   : > { %v2407_v33 = vrot.slane %v2347_v50, 1  ;;  %v2595_v38 = vrot.slane %v2347_v50, 2  ;;  %v2718_v9 = vrot.slane %v2347_v50, 3  ;;  %3221 = vmatmul.msk.f32.gmra.mxu1 %vm2158_vm11, %v2347_v50 }
 0x552   : > { %v2596_v53 = vsel %vm469_vm4, %v2593_v45, %v2595_v38  ;;  %v2719_v54 = vsel %vm357_vm0, %v2716_v49, %v2718_v9  ;;  %v2408_v57 = vsel %vm348_vm3, %v2405_v42, %v2407_v33 }
 0x553   : > { %3240 = vmatmul.msk.f32.gmra.mxu2 %vm2158_vm11, %v2596_v53  ;;  %3260 = vmatmul.msk.f32.gmra.mxu3 %vm2158_vm11, %v2719_v54 }
 0x554   : > { %3208 = vmatmul.msk.f32.gmra.mxu0 %vm2158_vm11, %v2408_v57 }
 0x557   : > { %v2350_v44 = vpop.f32.mrf.mxu3 }
 0x558   : > { %v2409_v59 = vrot.slane %v2350_v44, 1  ;;  %v2597_v62 = vrot.slane %v2350_v44, 2  ;;  %v2720_v63 = vrot.slane %v2350_v44, 3  ;;  %3222 = vmatmul.msk.f32.gmra.mxu1 %vm2158_vm11, %v2350_v44 }
 0x55a   : > { %v2598_v56 = vsel %vm469_vm4, %v2595_v38, %v2597_v62  ;;  %v2721_v0 = vsel %vm357_vm0, %v2718_v9, %v2720_v63  ;;  %v2410_v6 = vsel %vm348_vm3, %v2407_v33, %v2409_v59 }
 0x55b   : > { %3241 = vmatmul.msk.f32.gmra.mxu2 %vm2158_vm11, %v2598_v56  ;;  %3261 = vmatmul.msk.f32.gmra.mxu3 %vm2158_vm11, %v2721_v0 }
 0x55c   : > { %3209 = vmatmul.msk.f32.gmra.mxu0 %vm2158_vm11, %v2410_v6 }
 0x55f   : > { %v2353_v7 = vpop.f32.mrf.mxu3 }
 0x560   : > { %v2411_v12 = vrot.slane %v2353_v7, 1  ;;  %v2599_v13 = vrot.slane %v2353_v7, 2  ;;  %v2722_v15 = vrot.slane %v2353_v7, 3  ;;  %3223 = vmatmul.msk.f32.gmra.mxu1 %vm2158_vm11, %v2353_v7 }
 0x562   : > { %v2600_v17 = vsel %vm469_vm4, %v2597_v62, %v2599_v13  ;;  %v2723_v21 = vsel %vm357_vm0, %v2720_v63, %v2722_v15  ;;  %v2412_v52 = vsel %vm348_vm3, %v2409_v59, %v2411_v12 }
 0x563   : > { %3242 = vmatmul.msk.f32.gmra.mxu2 %vm2158_vm11, %v2600_v17  ;;  %3262 = vmatmul.msk.f32.gmra.mxu3 %vm2158_vm11, %v2723_v21 }
 0x564   : > { %3210 = vmatmul.msk.f32.gmra.mxu0 %vm2158_vm11, %v2412_v52 }
 0x567   : > { %v2356_v11 = vpop.f32.mrf.mxu3 }
 0x568   : > { %v2413_v55 = vrot.slane %v2356_v11, 1  ;;  %v2601_v61 = vrot.slane %v2356_v11, 2  ;;  %v2724_v23 = vrot.slane %v2356_v11, 3  ;;  %3224 = vmatmul.msk.f32.gmra.mxu1 %vm2158_vm11, %v2356_v11 }
 0x56a   : > { %v2602_v24 = vsel %vm469_vm4, %v2599_v13, %v2601_v61  ;;  %v2725_v3 = vsel %vm357_vm0, %v2722_v15, %v2724_v23  ;;  %v2414_v26 = vsel %vm348_vm3, %v2411_v12, %v2413_v55 }
 0x56b   : > { %3243 = vmatmul.msk.f32.gmra.mxu2 %vm2158_vm11, %v2602_v24  ;;  %3263 = vmatmul.msk.f32.gmra.mxu3 %vm2158_vm11, %v2725_v3 }
 0x56c   : > { %3211 = vmatmul.msk.f32.gmra.mxu0 %vm2158_vm11, %v2414_v26 }
 0x56f   : > { %v2359_v28 = vpop.f32.mrf.mxu3 }
 0x570   : > { %v2415_v29 = vrot.slane %v2359_v28, 1  ;;  %v2603_v30 = vrot.slane %v2359_v28, 2  ;;  %v2726_v2 = vrot.slane %v2359_v28, 3 }
 0x572   : > { %v2604_v47 = vsel %vm469_vm4, %v2601_v61, %v2603_v30  ;;  %v2727_v48 = vsel %vm357_vm0, %v2724_v23, %v2726_v2  ;;  %v2416_v51 = vsel %vm348_vm3, %v2413_v55, %v2415_v29  ;;  %vm2845_vm0 = vcmask 15360  }
 0x573   : > { %3244 = vmatmul.msk.f32.gmra.mxu2 %vm2158_vm11, %v2604_v47  ;;  %3264 = vmatmul.msk.f32.gmra.mxu3 %vm2158_vm11, %v2727_v48 }
 0x574   : > { %3212 = vmatmul.msk.f32.gmra.mxu0 %vm2158_vm11, %v2416_v51 }
 0x58d   : > { %v2535_v58 = vpop.f32.mrf.mxu1 }
 0x595   : > { %v2538_v60 = vpop.f32.mrf.mxu1 }
 0x599   : > { %v2458_v31 = vpop.f32.mrf.mxu0 }
 0x59a   : > { %v2536_v32 = vadd.f32 %v2535_v58, %v2458_v31 }
 0x59d   : > { %v2541_v19 = vpop.f32.mrf.mxu1 }
 0x59e   : > { %v2646_v10 = vpop.f32.mrf.mxu2  ;;  %v2769_v20 = vpop.f32.mrf.mxu3 }
 0x59f   : > { %v2682_v8 = vadd.f32 %v2646_v10, %v2536_v32 }
 0x5a1   : > { %v2805_v36 = vadd.f32 %v2769_v20, %v2682_v8  ;;  %v2461_v14 = vpop.f32.mrf.mxu0 }
 0x5a2   : > { %v2539_v40 = vadd.f32 %v2538_v60, %v2461_v14 }
 0x5a3   : > { %v2821_v39 = vadd.f32 %v4618_v34, %v2805_v36 }
 0x5a5   : > { %3299 = vtanh.f32 %v2821_v39  ;;  %v2544_v1 = vpop.f32.mrf.mxu1 }
 0x5a6   : > { %v2649_v35 = vpop.f32.mrf.mxu2  ;;  %v2772_v41 = vpop.f32.mrf.mxu3 }
 0x5a7   : > { %v2683_v18 = vadd.f32 %v2649_v35, %v2539_v40 }
 0x5a9   : > { %v2806_v43 = vadd.f32 %v2772_v41, %v2683_v18  ;;  %v2464_v25 = vpop.f32.mrf.mxu0 }
 0x5aa   : > { %v2542_v46 = vadd.f32 %v2541_v19, %v2464_v25 }
 0x5ab   : > { %v3300_v16 = vpop.eup %3299  ;;  %v2822_v27 = vadd.f32 %v4618_v34, %v2806_v43 }
 0x5ac   : > { %2846 = vst.msk [vmem:[%s4625_s27] sm:$0xff] %vm2845_vm0, %v3300_v16 }
 0x5ad   : > { %3301 = vtanh.f32 %v2822_v27  ;;  %v2547_v22 = vpop.f32.mrf.mxu1 }
 0x5ae   : > { %v2652_v42 = vpop.f32.mrf.mxu2  ;;  %v2775_v45 = vpop.f32.mrf.mxu3 }
 0x5af   : > { %v2684_v49 = vadd.f32 %v2652_v42, %v2542_v46 }
 0x5b1   : > { %v2807_v5 = vadd.f32 %v2775_v45, %v2684_v49  ;;  %v2467_v4 = vpop.f32.mrf.mxu0 }
 0x5b2   : > { %v2545_v33 = vadd.f32 %v2544_v1, %v2467_v4 }
 0x5b3   : > { %v3302_v37 = vpop.eup %3301  ;;  %v2823_v50 = vadd.f32 %v4618_v34, %v2807_v5 }
 0x5b4   : > { %2847 = vst.msk [vmem:[%s4625_s27 + $0x8] sm:$0xff] %vm2845_vm0, %v3302_v37 }
 0x5b5   : > { %3303 = vtanh.f32 %v2823_v50  ;;  %v2550_v54 = vpop.f32.mrf.mxu1 }
 0x5b6   : > { %v2655_v38 = vpop.f32.mrf.mxu2  ;;  %v2778_v9 = vpop.f32.mrf.mxu3 }
 0x5b7   : > { %v2685_v53 = vadd.f32 %v2655_v38, %v2545_v33 }
 0x5b9   : > { %v2808_v57 = vadd.f32 %v2778_v9, %v2685_v53  ;;  %v2470_v44 = vpop.f32.mrf.mxu0 }
 0x5ba   : > { %v2548_v63 = vadd.f32 %v2547_v22, %v2470_v44 }
 0x5bb   : > { %v3304_v59 = vpop.eup %3303  ;;  %v2824_v62 = vadd.f32 %v4618_v34, %v2808_v57 }
 0x5bc   : > { %2848 = vst.msk [vmem:[%s4625_s27 + $0x10] sm:$0xff] %vm2845_vm0, %v3304_v59 }
 0x5bd   : > { %3305 = vtanh.f32 %v2824_v62  ;;  %v2553_v13 = vpop.f32.mrf.mxu1 }
 0x5be   : > { %v2658_v56 = vpop.f32.mrf.mxu2  ;;  %v2781_v0 = vpop.f32.mrf.mxu3 }
 0x5bf   : > { %v2686_v6 = vadd.f32 %v2658_v56, %v2548_v63 }
 0x5c1   : > { %v2809_v7 = vadd.f32 %v2781_v0, %v2686_v6  ;;  %v2473_v12 = vpop.f32.mrf.mxu0 }
 0x5c2   : > { %v2551_v21 = vadd.f32 %v2550_v54, %v2473_v12 }
 0x5c3   : > { %v3306_v15 = vpop.eup %3305  ;;  %v2825_v17 = vadd.f32 %v4618_v34, %v2809_v7 }
 0x5c4   : > { %2849 = vst.msk [vmem:[%s4625_s27 + $0x18] sm:$0xff] %vm2845_vm0, %v3306_v15 }
 0x5c5   : > { %3307 = vtanh.f32 %v2825_v17  ;;  %v2556_v26 = vpop.f32.mrf.mxu1 }
 0x5c6   : > { %v2661_v52 = vpop.f32.mrf.mxu2  ;;  %v2784_v11 = vpop.f32.mrf.mxu3 }
 0x5c7   : > { %v2687_v55 = vadd.f32 %v2661_v52, %v2551_v21 }
 0x5c9   : > { %v2810_v61 = vadd.f32 %v2784_v11, %v2687_v55  ;;  %v2476_v23 = vpop.f32.mrf.mxu0 }
 0x5ca   : > { %v2554_v28 = vadd.f32 %v2553_v13, %v2476_v23 }
 0x5cb   : > { %v3308_v24 = vpop.eup %3307  ;;  %v2826_v3 = vadd.f32 %v4618_v34, %v2810_v61 }
 0x5cc   : > { %2850 = vst.msk [vmem:[%s4625_s27 + $0x20] sm:$0xff] %vm2845_vm0, %v3308_v24 }
 0x5cd   : > { %3309 = vtanh.f32 %v2826_v3  ;;  %v2559_v31 = vpop.f32.mrf.mxu1 }
 0x5ce   : > { %v2664_v29 = vpop.f32.mrf.mxu2  ;;  %v2787_v30 = vpop.f32.mrf.mxu3 }
 0x5cf   : > { %v2688_v2 = vadd.f32 %v2664_v29, %v2554_v28 }
 0x5d1   : > { %v2811_v47 = vadd.f32 %v2787_v30, %v2688_v2  ;;  %v2479_v48 = vpop.f32.mrf.mxu0 }
 0x5d2   : > { %v2557_v60 = vadd.f32 %v2556_v26, %v2479_v48 }
 0x5d3   : > { %v3310_v51 = vpop.eup %3309  ;;  %v2827_v58 = vadd.f32 %v4618_v34, %v2811_v47 }
 0x5d4   : > { %2851 = vst.msk [vmem:[%s4625_s27 + $0x28] sm:$0xff] %vm2845_vm0, %v3310_v51 }
 0x5d5   : > { %3311 = vtanh.f32 %v2827_v58  ;;  %v2562_v41 = vpop.f32.mrf.mxu1 }
 0x5d6   : > { %v2667_v32 = vpop.f32.mrf.mxu2  ;;  %v2790_v19 = vpop.f32.mrf.mxu3 }
 0x5d7   : > { %v2689_v10 = vadd.f32 %v2667_v32, %v2557_v60 }
 0x5d9   : > { %v2812_v20 = vadd.f32 %v2790_v19, %v2689_v10  ;;  %v2482_v8 = vpop.f32.mrf.mxu0 }
 0x5da   : > { %v2560_v39 = vadd.f32 %v2559_v31, %v2482_v8 }
 0x5db   : > { %v3312_v36 = vpop.eup %3311  ;;  %v2828_v14 = vadd.f32 %v4618_v34, %v2812_v20 }
 0x5dc   : > { %2852 = vst.msk [vmem:[%s4625_s27 + $0x30] sm:$0xff] %vm2845_vm0, %v3312_v36 }
 0x5dd   : > { %3313 = vtanh.f32 %v2828_v14  ;;  %v2565_v5 = vpop.f32.mrf.mxu1 }
 0x5de   : > { %v2670_v40 = vpop.f32.mrf.mxu2  ;;  %v2793_v1 = vpop.f32.mrf.mxu3 }
 0x5df   : > { %v2690_v35 = vadd.f32 %v2670_v40, %v2560_v39 }
 0x5e1   : > { %v2813_v18 = vadd.f32 %v2793_v1, %v2690_v35  ;;  %v2485_v43 = vpop.f32.mrf.mxu0 }
 0x5e2   : > { %v2563_v27 = vadd.f32 %v2562_v41, %v2485_v43 }
 0x5e3   : > { %v3314_v25 = vpop.eup %3313  ;;  %v2829_v16 = vadd.f32 %v4618_v34, %v2813_v18 }
 0x5e4   : > { %2853 = vst.msk [vmem:[%s4625_s27 + $0x38] sm:$0xff] %vm2845_vm0, %v3314_v25 }
 0x5e5   : > { %3315 = vtanh.f32 %v2829_v16  ;;  %v2568_v59 = vpop.f32.mrf.mxu1 }
 0x5e6   : > { %v2673_v46 = vpop.f32.mrf.mxu2  ;;  %v2796_v22 = vpop.f32.mrf.mxu3 }
 0x5e7   : > { %v2691_v42 = vadd.f32 %v2673_v46, %v2563_v27 }
 0x5e9   : > { %v2814_v45 = vadd.f32 %v2796_v22, %v2691_v42  ;;  %v2488_v49 = vpop.f32.mrf.mxu0 }
 0x5ea   : > { %v2566_v50 = vadd.f32 %v2565_v5, %v2488_v49 }
 0x5eb   : > { %v3316_v4 = vpop.eup %3315  ;;  %v2830_v37 = vadd.f32 %v4618_v34, %v2814_v45 }
 0x5ec   : > { %2854 = vst.msk [vmem:[%s4625_s27 + $0x40] sm:$0xff] %vm2845_vm0, %v3316_v4 }
 0x5ed   : > { %3317 = vtanh.f32 %v2830_v37 }
 0x5ee   : > { %v2676_v33 = vpop.f32.mrf.mxu2  ;;  %v2799_v38 = vpop.f32.mrf.mxu3 }
 0x5ef   : > { %v2692_v9 = vadd.f32 %v2676_v33, %v2566_v50 }
 0x5f1   : > { %v2815_v53 = vadd.f32 %v2799_v38, %v2692_v9  ;;  %v2491_v54 = vpop.f32.mrf.mxu0 }
 0x5f2   : > { %v2569_v62 = vadd.f32 %v2568_v59, %v2491_v54 }
 0x5f3   : > { %v3318_v57 = vpop.eup %3317  ;;  %v2831_v44 = vadd.f32 %v4618_v34, %v2815_v53 }
 0x5f4   : > { %2855 = vst.msk [vmem:[%s4625_s27 + $0x48] sm:$0xff] %vm2845_vm0, %v3318_v57 }
 0x5f5   : > { %3319 = vtanh.f32 %v2831_v44 }
 0x5f6   : > { %v2679_v63 = vpop.f32.mrf.mxu2  ;;  %v2802_v0 = vpop.f32.mrf.mxu3 }
 0x5f7   : > { %v2693_v56 = vadd.f32 %v2679_v63, %v2569_v62 }
 0x5f9   : > { %v2816_v6 = vadd.f32 %v2802_v0, %v2693_v56 }
 0x5fb   : > { %v3320_v7 = vpop.eup %3319  ;;  %v2832_v12 = vadd.f32 %v4618_v34, %v2816_v6 }
 0x5fc   : > { %2856 = vst.msk [vmem:[%s4625_s27 + $0x50] sm:$0xff] %vm2845_vm0, %v3320_v7 }
 0x5fd   : > { %3321 = vtanh.f32 %v2832_v12 }
 0x603   : > { %v3322_v13 = vpop.eup %3321 }
 0x604   : > { %2857 = vst.msk [vmem:[%s4625_s27 + $0x58] sm:$0xff] %vm2845_vm0, %v3322_v13 }
 0x605 PF: > { %s19_s30 = sadd.s32 1, %s3329_s30  }
 0x606   : > { %p16_p4 = scmp.ge.s32.totalorder %s19_s30, 4  }
 0x608   :  { %18 = sbr.rel (!%p16_p4) target bundleno = 1 (0x1), region = 106 }

</bundles_post_ra>
